<compile_context>
chip_gen: v6e
topology: v6e:2x2x1
jax: 0.10.0
libtpu: 0.0.40
codegen_flags: <defaults>
</compile_context>

<pallas_src>
import functools
import math

import jax
import jax.numpy as jnp
from jax.experimental import pallas as pl
from jax.experimental.pallas import tpu as pltpu

EPS = 1e-5       # nn.LayerNorm default
NEG_INF = -1e9   # additive key-padding mask value


# --------------------------------- kernel ------------------------------------

def keypoints_encoder_kernel(
        coords_ref,    # (2, Bt, S, in_dim) f32    channel 0 = x, 1 = y
        mask_ref,      # (Bt, 1, S) f32            1.0 = valid keypoint, 0.0 = pad
        w_coord_ref,   # (2, in_dim, D) f32
        base_ref,      # (2, S, D) f32             pos encoding + coord-mapping bias
        ln_ref,        # (2, 2, D) f32             [gamma; beta] per channel
        ffn_w1_ref,    # (2, D, F) wdt
        ffn_b1_ref,    # (2, F) f32
        ffn_w2_ref,    # (2, F, D) wdt
        ffn_b2_ref,    # (2, D) f32
        attn_wq_ref,   # (2, D, D) wdt             1/sqrt(head_dim) pre-folded
        attn_wkv_ref,  # (2, D, 2D) wdt            [Wk | Wv] fused along lanes
        attn_wo_ref,   # (2, D, D) wdt
        attn_b_ref,    # (2, 4D) f32               [bq*scale | bk | bv | bo]
        out_ref,       # (2, Bt, S, D) f32
        o_scratch,     # VMEM (Bt, S, D) f32       head-output concat buffer
        *, num_heads):
    f32 = jnp.float32
    wdt = ffn_w1_ref.dtype                  # matmul-operand dtype (bf16 by default)
    _, Bt, S, in_dim = coords_ref.shape
    D = base_ref.shape[-1]
    H = num_heads
    hd = D // H
    rows = Bt * S                           # every projection batched over Bt*S rows

    coords = coords_ref[...]                              # (2, Bt, S, in_dim)
    mask_add = (1.0 - mask_ref[...]) * NEG_INF            # (Bt, 1, S)

    # --- CoordinateMapping + StaticPositionalEncoding (pos + bias pre-folded) ---
    base = base_ref[...][:, None]                         # (2, 1, S, D)
    if in_dim <= 4:
        # K = in_dim is MXU-degenerate -> VPU broadcast-FMA outer products.
        emb = base + coords[..., 0:1] * w_coord_ref[:, 0, :][:, None, None, :]
        for i in range(1, in_dim):
            emb = emb + coords[..., i:i + 1] * w_coord_ref[:, i, :][:, None, None, :]
    else:
        # Generic path: one rank-2 matmul per channel (Mosaic-friendly; the
        # rank-4 batched dot the review suggested is not a reliably-supported
        # Mosaic dot_general form, and with 2 channels it issues the same work).
        emb = jnp.stack(
            [jnp.dot(coords[c].reshape(rows, in_dim).astype(wdt),
                     w_coord_ref[c].astype(wdt),
                     preferred_element_type=f32).reshape(Bt, S, D)
             for c in range(2)], axis=0) + base

    # --- self_attn_{x,y}_layer_norm (element-wise, fused over both channels) ---
    gamma = ln_ref[0][:, None, None, :]                   # (2, 1, 1, D)
    beta = ln_ref[1][:, None, None, :]
    mean = jnp.mean(emb, axis=-1, keepdims=True)
    var = jnp.mean((emb - mean) ** 2, axis=-1, keepdims=True)
    emb = (emb - mean) * jax.lax.rsqrt(var + EPS) * gamma + beta

    # --- ffn_x / ffn_y: residual MLP, rank-2 matmuls over Bt*S rows ---
    def ffn(c, x):                                        # x: (Bt, S, D) f32
        x2 = x.reshape(rows, D).astype(wdt)               # free: S % 8 == 0
        h1 = jnp.dot(x2, ffn_w1_ref[c],
                     preferred_element_type=f32) + ffn_b1_ref[c:c + 1, :]
        h1 = jnp.maximum(h1, 0.0)
        o = jnp.dot(h1.astype(wdt), ffn_w2_ref[c],
                    preferred_element_type=f32) + ffn_b2_ref[c:c + 1, :]
        return x + o.reshape(Bt, S, D)

    x_emb = ffn(0, emb[0])
    y_emb = ffn(1, emb[1])

    # --- cross_attn_x / cross_attn_y: residual MHA with key-padding mask ---
    def attend(c, q_in, kv_in):
        # One fused Q projection and one fused K|V projection per channel
        # (scale folded into Wq/bq wrapper-side).
        q2 = jnp.dot(q_in.reshape(rows, D).astype(wdt), attn_wq_ref[c],
                     preferred_element_type=f32) + attn_b_ref[c:c + 1, 0:D]
        kv2 = jnp.dot(kv_in.reshape(rows, D).astype(wdt), attn_wkv_ref[c],
                      preferred_element_type=f32) + attn_b_ref[c:c + 1, D:3 * D]
        q = q2.reshape(Bt, S, D)
        kv = kv2.reshape(Bt, S, 2 * D)
        for h in range(H):                                # head views = lane slices
            qh = q[..., h * hd:(h + 1) * hd]
            kh = kv[..., h * hd:(h + 1) * hd]
            vh = kv[..., D + h * hd:D + (h + 1) * hd]
            s = jnp.einsum('bqe,bke->bqk', qh.astype(wdt), kh.astype(wdt),
                           preferred_element_type=f32)
            s = s + mask_add                              # key-padding mask
            s = s - jnp.max(s, axis=-1, keepdims=True)
            p = jnp.exp(s)
            p = p * pl.reciprocal(jnp.sum(p, axis=-1, keepdims=True), approx=True)
            # write this head's output into its lane slice of the scratch buffer
            o_scratch[:, :, h * hd:(h + 1) * hd] = jnp.einsum(
                'bqk,bke->bqe', p.astype(wdt), vh.astype(wdt),
                preferred_element_type=f32)
        # single (D, D) output projection over the concatenated head outputs
        proj = jnp.dot(o_scratch[...].reshape(rows, D).astype(wdt), attn_wo_ref[c],
                       preferred_element_type=f32) + attn_b_ref[c:c + 1, 3 * D:]
        return q_in + proj.reshape(Bt, S, D)

    x_new = attend(0, x_emb, y_emb)
    out_ref[0] = x_new.astype(out_ref.dtype)
    y_new = attend(1, y_emb, x_new)        # y attends to the *updated* x (PyTorch order)
    out_ref[1] = y_new.astype(out_ref.dtype)


# ------------------------------ parameter packing -----------------------------

def pack_params(params, *, num_heads, wdtype=jnp.bfloat16):
    """One-time parameter packing, hoisted out of the per-call path.

    - Wk|Wv fused to (D, 2D); Wq/bq pre-scaled by 1/sqrt(head_dim).
    - Biases / LN vectors kept in small separate f32 tensors.
    - Positional encoding + coordinate-mapping bias folded into `base`.
    - Matmul weights pre-cast to `wdtype` (bf16 -> full MXU rate on v6e/v7x).
    """
    f32 = jnp.float32
    D = params['w_coord'].shape[-1]
    assert D % num_heads == 0
    scale = 1.0 / math.sqrt(D // num_heads)

    base = params['pos'][None].astype(f32) + params['b_coord'][:, None, :].astype(f32)
    ln = jnp.stack([params['ln_g'], params['ln_b']], axis=0).astype(f32)      # (2,2,D)
    aw, ab = params['attn_w'], params['attn_b']            # (2,4,D,D), (2,4,D)
    attn_b = jnp.concatenate([ab[:, 0] * scale, ab[:, 1], ab[:, 2], ab[:, 3]],
                             axis=-1).astype(f32)           # (2, 4D)
    return {
        'w_coord': params['w_coord'].astype(f32),           # (2, in_dim, D)
        'base': base,                                        # (2, S, D)
        'ln': ln,                                            # (2, 2, D)
        'ffn_w1': params['ffn_w1'].astype(wdtype),           # (2, D, F)
        'ffn_b1': params['ffn_b1'].astype(f32),              # (2, F)
        'ffn_w2': params['ffn_w2'].astype(wdtype),           # (2, F, D)
        'ffn_b2': params['ffn_b2'].astype(f32),              # (2, D)
        'attn_wq': (aw[:, 0] * scale).astype(wdtype),        # (2, D, D)
        'attn_wkv': jnp.concatenate([aw[:, 1], aw[:, 2]], axis=-1).astype(wdtype),
        'attn_wo': aw[:, 3].astype(wdtype),                  # (2, D, D)
        'attn_b': attn_b,                                    # (2, 4D)
    }


# --------------------------------- wrapper -----------------------------------

def _pick_batch_block(batch, seq_len, target_rows=256):
    """Batch tile: one block when the whole batch fits ~256 MXU rows; otherwise the
    largest multiple-of-8 divisor that does.  The grid is a *serial* loop on
    v5e/v6e (single TensorCore) so extra steps only add ~0.35us each -- never
    split just to "parallelize" tiny work."""
    if batch * seq_len <= target_rows:
        return batch
    best = batch
    for bt in range(8, batch, 8):
        if batch % bt == 0 and bt * seq_len <= target_rows:
            best = bt
    return best


def keypoints_encoder_layer(x_coord, y_coord, attention_mask, packed, *,
                            num_heads, batch_block=None):
    """x_coord/y_coord: (B, S, in_dim); attention_mask: (B, S), 1 = valid keypoint.
    `packed` comes from pack_params() (computed once, reused every call)."""
    f32 = jnp.float32
    B, S, in_dim = x_coord.shape
    D = packed['base'].shape[-1]
    assert D % num_heads == 0

    Bt = batch_block if batch_block is not None else _pick_batch_block(B, S)
    assert B % Bt == 0
    n_blocks = B // Bt

    # coords kept (2, B, S, in_dim): the tensor is tiny and the in_dim<=4 FMA path
    # needs in_dim minor for the lane-broadcast; re-layout would add a transpose.
    coords = jnp.stack([x_coord, y_coord], axis=0).astype(f32)
    mask3 = attention_mask.reshape(B, 1, S).astype(f32)

    def const_spec(shape):
        return pl.BlockSpec(shape, lambda b: (0,) * len(shape))

    in_specs = [
        pl.BlockSpec((2, Bt, S, in_dim), lambda b: (0, b, 0, 0)),     # coords
        pl.BlockSpec((Bt, 1, S), lambda b: (b, 0, 0)),                # mask
        const_spec(packed['w_coord'].shape),
        const_spec(packed['base'].shape),
        const_spec(packed['ln'].shape),
        const_spec(packed['ffn_w1'].shape),
        const_spec(packed['ffn_b1'].shape),
        const_spec(packed['ffn_w2'].shape),
        const_spec(packed['ffn_b2'].shape),
        const_spec(packed['attn_wq'].shape),
        const_spec(packed['attn_wkv'].shape),
        const_spec(packed['attn_wo'].shape),
        const_spec(packed['attn_b'].shape),
    ]
    # Output kept (2, B, S, D): at S*D=256 (4 KB total) a lane-dense (2,B,S*D)
    # store would need a sublane->lane relayout costing more than the couple of
    # masked vst it removes, and the HBM writeback is contiguous either way.
    out_specs = pl.BlockSpec((2, Bt, S, D), lambda b: (0, b, 0, 0))
    out_shape = jax.ShapeDtypeStruct((2, B, S, D), f32)

    grid_spec = pltpu.PrefetchScalarGridSpec(
        num_scalar_prefetch=0,
        grid=(n_blocks,),
        in_specs=in_specs,
        out_specs=out_specs,
        scratch_shapes=[pltpu.VMEM((Bt, S, D), f32)],      # head-output concat buffer
    )

    fn = pl.pallas_call(
        functools.partial(keypoints_encoder_kernel, num_heads=num_heads),
        grid_spec=grid_spec,
        out_shape=out_shape,
        compiler_params=pltpu.CompilerParams(
            dimension_semantics=("parallel",),
            # explicit scoped-VMEM limit (v7x default scoped = 32 MiB, 64 MiB physical)
            vmem_limit_bytes=32 * 1024 * 1024),
    )
    out = fn(coords, mask3, packed['w_coord'], packed['base'], packed['ln'],
             packed['ffn_w1'], packed['ffn_b1'], packed['ffn_w2'], packed['ffn_b2'],
             packed['attn_wq'], packed['attn_wkv'], packed['attn_wo'], packed['attn_b'])
    return out[0], out[1]


# ---------------------------- pure-JAX reference ------------------------------

def reference_forward(x_coord, y_coord, attention_mask, params, *, num_heads):
    def ln(x, g, b):
        m = jnp.mean(x, axis=-1, keepdims=True)
        v = jnp.mean((x - m) ** 2, axis=-1, keepdims=True)
        return (x - m) * jax.lax.rsqrt(v + EPS) * g + b

    def ffn(x, w1, b1, w2, b2):
        h = jnp.maximum(x @ w1 + b1, 0.0)
        return x + h @ w2 + b2

    def mha(q_in, kv_in, mask_add, w, bias):
        B, S, D = q_in.shape
        H = num_heads
        hd = D // H
        q = (q_in @ w[0] + bias[0]).reshape(B, S, H, hd).transpose(0, 2, 1, 3)
        k = (kv_in @ w[1] + bias[1]).reshape(B, S, H, hd).transpose(0, 2, 1, 3)
        v = (kv_in @ w[2] + bias[2]).reshape(B, S, H, hd).transpose(0, 2, 1, 3)
        s = jnp.einsum('bhqd,bhkd->bhqk', q, k) / math.sqrt(hd)
        s = s + mask_add[:, None, :, :]
        p = jax.nn.softmax(s, axis=-1)
        o = jnp.einsum('bhqk,bhkd->bhqd', p, v).transpose(0, 2, 1, 3).reshape(B, S, D)
        return q_in + o @ w[3] + bias[3]

    B, S, _ = x_coord.shape
    mask_add = (1.0 - attention_mask.reshape(B, 1, S).astype(jnp.float32)) * NEG_INF
    x = x_coord @ params['w_coord'][0] + params['b_coord'][0]
    y = y_coord @ params['w_coord'][1] + params['b_coord'][1]
    x = x + params['pos'][None]
    y = y + params['pos'][None]
    x = ln(x, params['ln_g'][0], params['ln_b'][0])
    y = ln(y, params['ln_g'][1], params['ln_b'][1])
    x = ffn(x, params['ffn_w1'][0], params['ffn_b1'][0],
            params['ffn_w2'][0], params['ffn_b2'][0])
    y = ffn(y, params['ffn_w1'][1], params['ffn_b1'][1],
            params['ffn_w2'][1], params['ffn_b2'][1])
    x_new = mha(x, y, mask_add, params['attn_w'][0], params['attn_b'][0])
    y_new = mha(y, x_new, mask_add, params['attn_w'][1], params['attn_b'][1])
    return x_new, y_new


# ------------------------------ parameter setup -------------------------------

def sinusoidal_pos_encoding(seq_len, dim):
    pos = jnp.arange(seq_len, dtype=jnp.float32)[:, None]
    i = jnp.arange(dim // 2, dtype=jnp.float32)[None, :]
    angles = pos / jnp.power(10000.0, 2.0 * i / dim)
    pe = jnp.zeros((seq_len, dim), jnp.float32)
    pe = pe.at[:, 0::2].set(jnp.sin(angles))
    pe = pe.at[:, 1::2].set(jnp.cos(angles))
    return pe


def init_params(key, in_dim, out_dim, ff_dim, seq_len):
    ks = jax.random.split(key, 8)
    s = 0.05
    return {
        'w_coord': s * jax.random.normal(ks[0], (2, in_dim, out_dim), jnp.float32),
        'b_coord': s * jax.random.normal(ks[1], (2, out_dim), jnp.float32),
        'pos':     sinusoidal_pos_encoding(seq_len, out_dim),
        'ln_g':    jnp.ones((2, out_dim), jnp.float32),
        'ln_b':    jnp.zeros((2, out_dim), jnp.float32),
        'ffn_w1':  s * jax.random.normal(ks[2], (2, out_dim, ff_dim), jnp.float32),
        'ffn_b1':  s * jax.random.normal(ks[3], (2, ff_dim), jnp.float32),
        'ffn_w2':  s * jax.random.normal(ks[4], (2, ff_dim, out_dim), jnp.float32),
        'ffn_b2':  s * jax.random.normal(ks[5], (2, out_dim), jnp.float32),
        # attn_w[c, p]: c in {cross_attn_x, cross_attn_y}, p in {Wq, Wk, Wv, Wo}
        'attn_w':  s * jax.random.normal(ks[6], (2, 4, out_dim, out_dim), jnp.float32),
        'attn_b':  s * jax.random.normal(ks[7], (2, 4, out_dim), jnp.float32),
    }


# ----------------------------------- main -------------------------------------

if __name__ == "__main__":
    B, S, IN_DIM, OUT_DIM, FF_DIM, HEADS = 2, 8, 2, 32, 64, 4

    key = jax.random.PRNGKey(0)
    k_x, k_y, k_p = jax.random.split(key, 3)

    x_coord = jax.random.uniform(k_x, (B, S, IN_DIM), jnp.float32)
    y_coord = jax.random.uniform(k_y, (B, S, IN_DIM), jnp.float32)
    attention_mask = jnp.array(
        [[1, 1, 1, 1, 1, 1, 1, 1],
         [1, 1, 1, 1, 1, 0, 0, 0]], dtype=jnp.float32)     # 1 = valid keypoint

    params = init_params(k_p, IN_DIM, OUT_DIM, FF_DIM, S)
    packed = pack_params(params, num_heads=HEADS)           # hoisted: once, not per call

    fwd = jax.jit(functools.partial(keypoints_encoder_layer, num_heads=HEADS))
    x_embed, y_embed = fwd(x_coord, y_coord, attention_mask, packed)
    jax.block_until_ready((x_embed, y_embed))

    x_ref, y_ref = reference_forward(
        x_coord, y_coord, attention_mask, params, num_heads=HEADS)

    assert x_embed.shape == (B, S, OUT_DIM) and y_embed.shape == (B, S, OUT_DIM)
    assert bool(jnp.all(jnp.isfinite(x_embed))) and bool(jnp.all(jnp.isfinite(y_embed)))
    # bf16 MXU operands + approx reciprocal -> loose-but-meaningful tolerance.
    assert bool(jnp.allclose(x_embed, x_ref, atol=2e-2, rtol=2e-2))
    assert bool(jnp.allclose(y_embed, y_ref, atol=2e-2, rtol=2e-2))
    print("KERNEL_OK")
</pallas_src>

<mosaic_0001>
module attributes {stable_mosaic.version = 11 : i64} {
  func.func @keypoints_encoder_kernel(%arg0: i32, %arg1: memref<2x2x8x2xf32, #tpu.memory_space<vmem>>, %arg2: memref<2x1x8xf32, #tpu.memory_space<vmem>>, %arg3: memref<2x2x32xf32, #tpu.memory_space<vmem>>, %arg4: memref<2x8x32xf32, #tpu.memory_space<vmem>>, %arg5: memref<2x2x32xf32, #tpu.memory_space<vmem>>, %arg6: memref<2x32x64xbf16, #tpu.memory_space<vmem>>, %arg7: memref<2x64xf32, #tpu.memory_space<vmem>>, %arg8: memref<2x64x32xbf16, #tpu.memory_space<vmem>>, %arg9: memref<2x32xf32, #tpu.memory_space<vmem>>, %arg10: memref<2x32x32xbf16, #tpu.memory_space<vmem>>, %arg11: memref<2x32x64xbf16, #tpu.memory_space<vmem>>, %arg12: memref<2x32x32xbf16, #tpu.memory_space<vmem>>, %arg13: memref<2x128xf32, #tpu.memory_space<vmem>>, %arg14: memref<2x2x8x32xf32, #tpu.memory_space<vmem>>, %arg15: memref<2x8x32xf32, #tpu.memory_space<vmem>>) attributes {dimension_semantics = [#tpu.dimension_semantics<parallel>], iteration_bounds = array<i64: 1>, scalar_prefetch = 0 : i64, scratch_operands = 1 : i64, tpu.core_type = #tpu.core_type<tc>, window_params = [{transform_indices = @transform_0, window_bounds = array<i64: 2, 2, 8, 2>}, {transform_indices = @transform_1, window_bounds = array<i64: 2, 1, 8>}, {pipeline_mode = #tpu.pipeline_mode<synchronous>, transform_indices = @transform_2, window_bounds = array<i64: 2, 2, 32>}, {pipeline_mode = #tpu.pipeline_mode<synchronous>, transform_indices = @transform_3, window_bounds = array<i64: 2, 8, 32>}, {pipeline_mode = #tpu.pipeline_mode<synchronous>, transform_indices = @transform_4, window_bounds = array<i64: 2, 2, 32>}, {pipeline_mode = #tpu.pipeline_mode<synchronous>, transform_indices = @transform_5, window_bounds = array<i64: 2, 32, 64>}, {pipeline_mode = #tpu.pipeline_mode<synchronous>, transform_indices = @transform_6, window_bounds = array<i64: 2, 64>}, {pipeline_mode = #tpu.pipeline_mode<synchronous>, transform_indices = @transform_7, window_bounds = array<i64: 2, 64, 32>}, {pipeline_mode = #tpu.pipeline_mode<synchronous>, transform_indices = @transform_8, window_bounds = array<i64: 2, 32>}, {pipeline_mode = #tpu.pipeline_mode<synchronous>, transform_indices = @transform_9, window_bounds = array<i64: 2, 32, 32>}, {pipeline_mode = #tpu.pipeline_mode<synchronous>, transform_indices = @transform_10, window_bounds = array<i64: 2, 32, 64>}, {pipeline_mode = #tpu.pipeline_mode<synchronous>, transform_indices = @transform_11, window_bounds = array<i64: 2, 32, 32>}, {pipeline_mode = #tpu.pipeline_mode<synchronous>, transform_indices = @transform_12, window_bounds = array<i64: 2, 128>}, {transform_indices = @transform_13, window_bounds = array<i64: 2, 2, 8, 32>}]} {
    %c0 = arith.constant 0 : index
    %c0_0 = arith.constant 0 : index
    %c0_1 = arith.constant 0 : index
    %c0_2 = arith.constant 0 : index
    %0 = vector.load %arg1[%c0, %c0_0, %c0_1, %c0_2] : memref<2x2x8x2xf32, #tpu.memory_space<vmem>>, vector<2x2x8x2xf32>
    %c0_3 = arith.constant 0 : index
    %c0_4 = arith.constant 0 : index
    %c0_5 = arith.constant 0 : index
    %1 = vector.load %arg2[%c0_3, %c0_4, %c0_5] : memref<2x1x8xf32, #tpu.memory_space<vmem>>, vector<2x1x8xf32>
    %cst = arith.constant 1.000000e+00 : f32
    %2 = vector.broadcast %cst : f32 to vector<2x1x8xf32>
    %3 = arith.subf %2, %1 : vector<2x1x8xf32>
    %cst_6 = arith.constant -1.000000e+09 : f32
    %4 = vector.broadcast %cst_6 : f32 to vector<2x1x8xf32>
    %5 = arith.mulf %3, %4 : vector<2x1x8xf32>
    %c0_7 = arith.constant 0 : index
    %c0_8 = arith.constant 0 : index
    %c0_9 = arith.constant 0 : index
    %6 = vector.load %arg4[%c0_7, %c0_8, %c0_9] : memref<2x8x32xf32, #tpu.memory_space<vmem>>, vector<2x8x32xf32>
    %7 = vector.shape_cast %6 : vector<2x8x32xf32> to vector<2x1x8x32xf32>
    %8 = vector.extract_strided_slice %0 {offsets = [0, 0, 0, 0], sizes = [2, 2, 8, 1], strides = [1, 1, 1, 1]} : vector<2x2x8x2xf32> to vector<2x2x8x1xf32>
    %c0_10 = arith.constant 0 : index
    %c0_11 = arith.constant 0 : index
    %c0_12 = arith.constant 0 : index
    %9 = vector.load %arg3[%c0_10, %c0_11, %c0_12] : memref<2x2x32xf32, #tpu.memory_space<vmem>>, vector<2x1x32xf32>
    %10 = vector.shape_cast %9 : vector<2x1x32xf32> to vector<2x32xf32>
    %11 = vector.shape_cast %10 : vector<2x32xf32> to vector<2x1x1x32xf32>
    %12 = vector.broadcast %8 : vector<2x2x8x1xf32> to vector<2x2x8x32xf32>
    %13 = vector.broadcast %11 : vector<2x1x1x32xf32> to vector<2x2x8x32xf32>
    %14 = arith.mulf %12, %13 : vector<2x2x8x32xf32>
    %15 = vector.broadcast %7 : vector<2x1x8x32xf32> to vector<2x2x8x32xf32>
    %16 = arith.addf %15, %14 : vector<2x2x8x32xf32>
    %17 = vector.extract_strided_slice %0 {offsets = [0, 0, 0, 1], sizes = [2, 2, 8, 1], strides = [1, 1, 1, 1]} : vector<2x2x8x2xf32> to vector<2x2x8x1xf32>
    %c0_13 = arith.constant 0 : index
    %c1 = arith.constant 1 : index
    %c0_14 = arith.constant 0 : index
    %18 = vector.load %arg3[%c0_13, %c1, %c0_14] : memref<2x2x32xf32, #tpu.memory_space<vmem>>, vector<2x1x32xf32>
    %19 = vector.shape_cast %18 : vector<2x1x32xf32> to vector<2x32xf32>
    %20 = vector.shape_cast %19 : vector<2x32xf32> to vector<2x1x1x32xf32>
    %21 = vector.broadcast %17 : vector<2x2x8x1xf32> to vector<2x2x8x32xf32>
    %22 = vector.broadcast %20 : vector<2x1x1x32xf32> to vector<2x2x8x32xf32>
    %23 = arith.mulf %21, %22 : vector<2x2x8x32xf32>
    %24 = arith.addf %16, %23 : vector<2x2x8x32xf32>
    %c0_15 = arith.constant 0 : index
    %c0_16 = arith.constant 0 : index
    %c0_17 = arith.constant 0 : index
    %25 = vector.load %arg5[%c0_15, %c0_16, %c0_17] : memref<2x2x32xf32, #tpu.memory_space<vmem>>, vector<1x2x32xf32>
    %26 = vector.shape_cast %25 : vector<1x2x32xf32> to vector<2x32xf32>
    %27 = vector.shape_cast %26 : vector<2x32xf32> to vector<2x1x1x32xf32>
    %c1_18 = arith.constant 1 : index
    %c0_19 = arith.constant 0 : index
    %c0_20 = arith.constant 0 : index
    %28 = vector.load %arg5[%c1_18, %c0_19, %c0_20] : memref<2x2x32xf32, #tpu.memory_space<vmem>>, vector<1x2x32xf32>
    %29 = vector.shape_cast %28 : vector<1x2x32xf32> to vector<2x32xf32>
    %30 = vector.shape_cast %29 : vector<2x32xf32> to vector<2x1x1x32xf32>
    %cst_21 = arith.constant dense<0.000000e+00> : vector<2x2x8xf32>
    %31 = vector.multi_reduction <add>, %24, %cst_21 [3] : vector<2x2x8x32xf32> to vector<2x2x8xf32>
    %32 = vector.shape_cast %31 : vector<2x2x8xf32> to vector<2x2x8x1xf32>
    %cst_22 = arith.constant 3.200000e+01 : f32
    %33 = vector.broadcast %cst_22 : f32 to vector<2x2x8x1xf32>
    %34 = arith.divf %32, %33 : vector<2x2x8x1xf32>
    %35 = vector.broadcast %34 : vector<2x2x8x1xf32> to vector<2x2x8x32xf32>
    %36 = arith.subf %24, %35 : vector<2x2x8x32xf32>
    %37 = arith.mulf %36, %36 : vector<2x2x8x32xf32>
    %cst_23 = arith.constant dense<0.000000e+00> : vector<2x2x8xf32>
    %38 = vector.multi_reduction <add>, %37, %cst_23 [3] : vector<2x2x8x32xf32> to vector<2x2x8xf32>
    %39 = vector.shape_cast %38 : vector<2x2x8xf32> to vector<2x2x8x1xf32>
    %cst_24 = arith.constant 3.200000e+01 : f32
    %40 = vector.broadcast %cst_24 : f32 to vector<2x2x8x1xf32>
    %41 = arith.divf %39, %40 : vector<2x2x8x1xf32>
    %42 = vector.broadcast %34 : vector<2x2x8x1xf32> to vector<2x2x8x32xf32>
    %43 = arith.subf %24, %42 : vector<2x2x8x32xf32>
    %cst_25 = arith.constant 9.99999974E-6 : f32
    %44 = vector.broadcast %cst_25 : f32 to vector<2x2x8x1xf32>
    %45 = arith.addf %41, %44 : vector<2x2x8x1xf32>
    %46 = math.rsqrt %45 : vector<2x2x8x1xf32>
    %47 = vector.broadcast %46 : vector<2x2x8x1xf32> to vector<2x2x8x32xf32>
    %48 = arith.mulf %43, %47 : vector<2x2x8x32xf32>
    %49 = vector.broadcast %27 : vector<2x1x1x32xf32> to vector<2x2x8x32xf32>
    %50 = arith.mulf %48, %49 : vector<2x2x8x32xf32>
    %51 = vector.broadcast %30 : vector<2x1x1x32xf32> to vector<2x2x8x32xf32>
    %52 = arith.addf %50, %51 : vector<2x2x8x32xf32>
    %53 = vector.extract_strided_slice %52 {offsets = [0, 0, 0, 0], sizes = [1, 2, 8, 32], strides = [1, 1, 1, 1]} : vector<2x2x8x32xf32> to vector<1x2x8x32xf32>
    %54 = vector.shape_cast %53 : vector<1x2x8x32xf32> to vector<2x8x32xf32>
    %55 = vector.shape_cast %54 : vector<2x8x32xf32> to vector<16x32xf32>
    %56 = arith.truncf %55 : vector<16x32xf32> to vector<16x32xbf16>
    %c0_26 = arith.constant 0 : index
    %c0_27 = arith.constant 0 : index
    %c0_28 = arith.constant 0 : index
    %57 = vector.load %arg6[%c0_26, %c0_27, %c0_28] : memref<2x32x64xbf16, #tpu.memory_space<vmem>>, vector<1x32x64xbf16>
    %58 = vector.shape_cast %57 : vector<1x32x64xbf16> to vector<32x64xbf16>
    %cst_29 = arith.constant dense<0.000000e+00> : vector<16x64xf32>
    %59 = tpu.matmul %56, %58, %cst_29 {dimension_numbers = #tpu.dot_dimension_numbers<[1], [0], [0], [1], [0, 0, 1, 1], [], []>} : vector<16x32xbf16>, vector<32x64xbf16>, vector<16x64xf32> -> vector<16x64xf32>
    %c0_30 = arith.constant 0 : index
    %c0_31 = arith.constant 0 : index
    %60 = vector.load %arg7[%c0_30, %c0_31] : memref<2x64xf32, #tpu.memory_space<vmem>>, vector<1x64xf32>
    %61 = vector.broadcast %60 : vector<1x64xf32> to vector<16x64xf32>
    %62 = arith.addf %59, %61 : vector<16x64xf32>
    %cst_32 = arith.constant 0.000000e+00 : f32
    %63 = vector.broadcast %cst_32 : f32 to vector<16x64xf32>
    %64 = arith.maximumf %62, %63 : vector<16x64xf32>
    %65 = arith.truncf %64 : vector<16x64xf32> to vector<16x64xbf16>
    %c0_33 = arith.constant 0 : index
    %c0_34 = arith.constant 0 : index
    %c0_35 = arith.constant 0 : index
    %66 = vector.load %arg8[%c0_33, %c0_34, %c0_35] : memref<2x64x32xbf16, #tpu.memory_space<vmem>>, vector<1x64x32xbf16>
    %67 = vector.shape_cast %66 : vector<1x64x32xbf16> to vector<64x32xbf16>
    %cst_36 = arith.constant dense<0.000000e+00> : vector<16x32xf32>
    %68 = tpu.matmul %65, %67, %cst_36 {dimension_numbers = #tpu.dot_dimension_numbers<[1], [0], [0], [1], [0, 0, 1, 1], [], []>} : vector<16x64xbf16>, vector<64x32xbf16>, vector<16x32xf32> -> vector<16x32xf32>
    %c0_37 = arith.constant 0 : index
    %c0_38 = arith.constant 0 : index
    %69 = vector.load %arg9[%c0_37, %c0_38] : memref<2x32xf32, #tpu.memory_space<vmem>>, vector<1x32xf32>
    %70 = vector.broadcast %69 : vector<1x32xf32> to vector<16x32xf32>
    %71 = arith.addf %68, %70 : vector<16x32xf32>
    %72 = vector.shape_cast %71 : vector<16x32xf32> to vector<2x8x32xf32>
    %73 = arith.addf %54, %72 : vector<2x8x32xf32>
    %74 = vector.extract_strided_slice %52 {offsets = [1, 0, 0, 0], sizes = [1, 2, 8, 32], strides = [1, 1, 1, 1]} : vector<2x2x8x32xf32> to vector<1x2x8x32xf32>
    %75 = vector.shape_cast %74 : vector<1x2x8x32xf32> to vector<2x8x32xf32>
    %76 = vector.shape_cast %75 : vector<2x8x32xf32> to vector<16x32xf32>
    %77 = arith.truncf %76 : vector<16x32xf32> to vector<16x32xbf16>
    %c1_39 = arith.constant 1 : index
    %c0_40 = arith.constant 0 : index
    %c0_41 = arith.constant 0 : index
    %78 = vector.load %arg6[%c1_39, %c0_40, %c0_41] : memref<2x32x64xbf16, #tpu.memory_space<vmem>>, vector<1x32x64xbf16>
    %79 = vector.shape_cast %78 : vector<1x32x64xbf16> to vector<32x64xbf16>
    %cst_42 = arith.constant dense<0.000000e+00> : vector<16x64xf32>
    %80 = tpu.matmul %77, %79, %cst_42 {dimension_numbers = #tpu.dot_dimension_numbers<[1], [0], [0], [1], [0, 0, 1, 1], [], []>} : vector<16x32xbf16>, vector<32x64xbf16>, vector<16x64xf32> -> vector<16x64xf32>
    %c1_43 = arith.constant 1 : index
    %c0_44 = arith.constant 0 : index
    %81 = vector.load %arg7[%c1_43, %c0_44] : memref<2x64xf32, #tpu.memory_space<vmem>>, vector<1x64xf32>
    %82 = vector.broadcast %81 : vector<1x64xf32> to vector<16x64xf32>
    %83 = arith.addf %80, %82 : vector<16x64xf32>
    %cst_45 = arith.constant 0.000000e+00 : f32
    %84 = vector.broadcast %cst_45 : f32 to vector<16x64xf32>
    %85 = arith.maximumf %83, %84 : vector<16x64xf32>
    %86 = arith.truncf %85 : vector<16x64xf32> to vector<16x64xbf16>
    %c1_46 = arith.constant 1 : index
    %c0_47 = arith.constant 0 : index
    %c0_48 = arith.constant 0 : index
    %87 = vector.load %arg8[%c1_46, %c0_47, %c0_48] : memref<2x64x32xbf16, #tpu.memory_space<vmem>>, vector<1x64x32xbf16>
    %88 = vector.shape_cast %87 : vector<1x64x32xbf16> to vector<64x32xbf16>
    %cst_49 = arith.constant dense<0.000000e+00> : vector<16x32xf32>
    %89 = tpu.matmul %86, %88, %cst_49 {dimension_numbers = #tpu.dot_dimension_numbers<[1], [0], [0], [1], [0, 0, 1, 1], [], []>} : vector<16x64xbf16>, vector<64x32xbf16>, vector<16x32xf32> -> vector<16x32xf32>
    %c1_50 = arith.constant 1 : index
    %c0_51 = arith.constant 0 : index
    %90 = vector.load %arg9[%c1_50, %c0_51] : memref<2x32xf32, #tpu.memory_space<vmem>>, vector<1x32xf32>
    %91 = vector.broadcast %90 : vector<1x32xf32> to vector<16x32xf32>
    %92 = arith.addf %89, %91 : vector<16x32xf32>
    %93 = vector.shape_cast %92 : vector<16x32xf32> to vector<2x8x32xf32>
    %94 = arith.addf %75, %93 : vector<2x8x32xf32>
    %95 = vector.shape_cast %73 : vector<2x8x32xf32> to vector<16x32xf32>
    %96 = arith.truncf %95 : vector<16x32xf32> to vector<16x32xbf16>
    %c0_52 = arith.constant 0 : index
    %c0_53 = arith.constant 0 : index
    %c0_54 = arith.constant 0 : index
    %97 = vector.load %arg10[%c0_52, %c0_53, %c0_54] : memref<2x32x32xbf16, #tpu.memory_space<vmem>>, vector<1x32x32xbf16>
    %98 = vector.shape_cast %97 : vector<1x32x32xbf16> to vector<32x32xbf16>
    %cst_55 = arith.constant dense<0.000000e+00> : vector<16x32xf32>
    %99 = tpu.matmul %96, %98, %cst_55 {dimension_numbers = #tpu.dot_dimension_numbers<[1], [0], [0], [1], [0, 0, 1, 1], [], []>} : vector<16x32xbf16>, vector<32x32xbf16>, vector<16x32xf32> -> vector<16x32xf32>
    %c0_56 = arith.constant 0 : index
    %c0_57 = arith.constant 0 : index
    %100 = vector.load %arg13[%c0_56, %c0_57] : memref<2x128xf32, #tpu.memory_space<vmem>>, vector<1x32xf32>
    %101 = vector.broadcast %100 : vector<1x32xf32> to vector<16x32xf32>
    %102 = arith.addf %99, %101 : vector<16x32xf32>
    %103 = vector.shape_cast %94 : vector<2x8x32xf32> to vector<16x32xf32>
    %104 = arith.truncf %103 : vector<16x32xf32> to vector<16x32xbf16>
    %c0_58 = arith.constant 0 : index
    %c0_59 = arith.constant 0 : index
    %c0_60 = arith.constant 0 : index
    %105 = vector.load %arg11[%c0_58, %c0_59, %c0_60] : memref<2x32x64xbf16, #tpu.memory_space<vmem>>, vector<1x32x64xbf16>
    %106 = vector.shape_cast %105 : vector<1x32x64xbf16> to vector<32x64xbf16>
    %cst_61 = arith.constant dense<0.000000e+00> : vector<16x64xf32>
    %107 = tpu.matmul %104, %106, %cst_61 {dimension_numbers = #tpu.dot_dimension_numbers<[1], [0], [0], [1], [0, 0, 1, 1], [], []>} : vector<16x32xbf16>, vector<32x64xbf16>, vector<16x64xf32> -> vector<16x64xf32>
    %c0_62 = arith.constant 0 : index
    %c32 = arith.constant 32 : index
    %108 = vector.load %arg13[%c0_62, %c32] : memref<2x128xf32, #tpu.memory_space<vmem>>, vector<1x64xf32>
    %109 = vector.broadcast %108 : vector<1x64xf32> to vector<16x64xf32>
    %110 = arith.addf %107, %109 : vector<16x64xf32>
    %111 = vector.shape_cast %102 : vector<16x32xf32> to vector<2x8x32xf32>
    %112 = vector.shape_cast %110 : vector<16x64xf32> to vector<2x8x64xf32>
    %113 = vector.extract_strided_slice %111 {offsets = [0, 0, 0], sizes = [2, 8, 8], strides = [1, 1, 1]} : vector<2x8x32xf32> to vector<2x8x8xf32>
    %114 = vector.extract_strided_slice %112 {offsets = [0, 0, 0], sizes = [2, 8, 8], strides = [1, 1, 1]} : vector<2x8x64xf32> to vector<2x8x8xf32>
    %115 = vector.extract_strided_slice %112 {offsets = [0, 0, 32], sizes = [2, 8, 8], strides = [1, 1, 1]} : vector<2x8x64xf32> to vector<2x8x8xf32>
    %116 = arith.truncf %113 : vector<2x8x8xf32> to vector<2x8x8xbf16>
    %117 = arith.truncf %114 : vector<2x8x8xf32> to vector<2x8x8xbf16>
    "tpu.trace_start"() <{level = 10 : i32, message = "bqe,bke->bqk"}> : () -> ()
    %cst_63 = arith.constant dense<0.000000e+00> : vector<2x8x8xf32>
    %118 = tpu.matmul %116, %117, %cst_63 {dimension_numbers = #tpu.dot_dimension_numbers<[2], [2], [1], [1], [0, 0, 0, 1, 1, 1], [0], [0]>} : vector<2x8x8xbf16>, vector<2x8x8xbf16>, vector<2x8x8xf32> -> vector<2x8x8xf32>
    "tpu.trace_stop"() : () -> ()
    %119 = vector.broadcast %5 : vector<2x1x8xf32> to vector<2x8x8xf32>
    %120 = arith.addf %118, %119 : vector<2x8x8xf32>
    %cst_64 = arith.constant dense<0xFF800000> : vector<2x8xf32>
    %121 = vector.multi_reduction <maximumf>, %120, %cst_64 [2] : vector<2x8x8xf32> to vector<2x8xf32>
    %122 = vector.shape_cast %121 : vector<2x8xf32> to vector<2x8x1xf32>
    %123 = vector.broadcast %122 : vector<2x8x1xf32> to vector<2x8x8xf32>
    %124 = arith.subf %120, %123 : vector<2x8x8xf32>
    %125 = math.exp %124 : vector<2x8x8xf32>
    %cst_65 = arith.constant dense<0.000000e+00> : vector<2x8xf32>
    %126 = vector.multi_reduction <add>, %125, %cst_65 [2] : vector<2x8x8xf32> to vector<2x8xf32>
    %127 = vector.shape_cast %126 : vector<2x8xf32> to vector<2x8x1xf32>
    %128 = tpu.reciprocal %127 {approx = true} : vector<2x8x1xf32> -> vector<2x8x1xf32>
    %129 = vector.broadcast %128 : vector<2x8x1xf32> to vector<2x8x8xf32>
    %130 = arith.mulf %125, %129 : vector<2x8x8xf32>
    %131 = arith.truncf %130 : vector<2x8x8xf32> to vector<2x8x8xbf16>
    %132 = arith.truncf %115 : vector<2x8x8xf32> to vector<2x8x8xbf16>
    "tpu.trace_start"() <{level = 10 : i32, message = "bqk,bke->bqe"}> : () -> ()
    %cst_66 = arith.constant dense<0.000000e+00> : vector<2x8x8xf32>
    %133 = tpu.matmul %131, %132, %cst_66 {dimension_numbers = #tpu.dot_dimension_numbers<[2], [1], [1], [2], [0, 0, 0, 1, 1, 2], [0], [0]>} : vector<2x8x8xbf16>, vector<2x8x8xbf16>, vector<2x8x8xf32> -> vector<2x8x8xf32>
    "tpu.trace_stop"() : () -> ()
    %c0_67 = arith.constant 0 : index
    %c0_68 = arith.constant 0 : index
    %c0_69 = arith.constant 0 : index
    %134 = vector.load %arg15[%c0_67, %c0_68, %c0_69] : memref<2x8x32xf32, #tpu.memory_space<vmem>>, vector<2x8x8xf32>
    tpu.vector_store %arg15[%c0_67, %c0_68, %c0_69], %133 {strides = array<i32>} : memref<2x8x32xf32, #tpu.memory_space<vmem>>, vector<2x8x8xf32>,
    %135 = vector.extract_strided_slice %111 {offsets = [0, 0, 8], sizes = [2, 8, 8], strides = [1, 1, 1]} : vector<2x8x32xf32> to vector<2x8x8xf32>
    %136 = vector.extract_strided_slice %112 {offsets = [0, 0, 8], sizes = [2, 8, 8], strides = [1, 1, 1]} : vector<2x8x64xf32> to vector<2x8x8xf32>
    %137 = vector.extract_strided_slice %112 {offsets = [0, 0, 40], sizes = [2, 8, 8], strides = [1, 1, 1]} : vector<2x8x64xf32> to vector<2x8x8xf32>
    %138 = arith.truncf %135 : vector<2x8x8xf32> to vector<2x8x8xbf16>
    %139 = arith.truncf %136 : vector<2x8x8xf32> to vector<2x8x8xbf16>
    "tpu.trace_start"() <{level = 10 : i32, message = "bqe,bke->bqk"}> : () -> ()
    %cst_70 = arith.constant dense<0.000000e+00> : vector<2x8x8xf32>
    %140 = tpu.matmul %138, %139, %cst_70 {dimension_numbers = #tpu.dot_dimension_numbers<[2], [2], [1], [1], [0, 0, 0, 1, 1, 1], [0], [0]>} : vector<2x8x8xbf16>, vector<2x8x8xbf16>, vector<2x8x8xf32> -> vector<2x8x8xf32>
    "tpu.trace_stop"() : () -> ()
    %141 = vector.broadcast %5 : vector<2x1x8xf32> to vector<2x8x8xf32>
    %142 = arith.addf %140, %141 : vector<2x8x8xf32>
    %cst_71 = arith.constant dense<0xFF800000> : vector<2x8xf32>
    %143 = vector.multi_reduction <maximumf>, %142, %cst_71 [2] : vector<2x8x8xf32> to vector<2x8xf32>
    %144 = vector.shape_cast %143 : vector<2x8xf32> to vector<2x8x1xf32>
    %145 = vector.broadcast %144 : vector<2x8x1xf32> to vector<2x8x8xf32>
    %146 = arith.subf %142, %145 : vector<2x8x8xf32>
    %147 = math.exp %146 : vector<2x8x8xf32>
    %cst_72 = arith.constant dense<0.000000e+00> : vector<2x8xf32>
    %148 = vector.multi_reduction <add>, %147, %cst_72 [2] : vector<2x8x8xf32> to vector<2x8xf32>
    %149 = vector.shape_cast %148 : vector<2x8xf32> to vector<2x8x1xf32>
    %150 = tpu.reciprocal %149 {approx = true} : vector<2x8x1xf32> -> vector<2x8x1xf32>
    %151 = vector.broadcast %150 : vector<2x8x1xf32> to vector<2x8x8xf32>
    %152 = arith.mulf %147, %151 : vector<2x8x8xf32>
    %153 = arith.truncf %152 : vector<2x8x8xf32> to vector<2x8x8xbf16>
    %154 = arith.truncf %137 : vector<2x8x8xf32> to vector<2x8x8xbf16>
    "tpu.trace_start"() <{level = 10 : i32, message = "bqk,bke->bqe"}> : () -> ()
    %cst_73 = arith.constant dense<0.000000e+00> : vector<2x8x8xf32>
    %155 = tpu.matmul %153, %154, %cst_73 {dimension_numbers = #tpu.dot_dimension_numbers<[2], [1], [1], [2], [0, 0, 0, 1, 1, 2], [0], [0]>} : vector<2x8x8xbf16>, vector<2x8x8xbf16>, vector<2x8x8xf32> -> vector<2x8x8xf32>
    "tpu.trace_stop"() : () -> ()
    %c0_74 = arith.constant 0 : index
    %c0_75 = arith.constant 0 : index
    %c8 = arith.constant 8 : index
    %156 = vector.load %arg15[%c0_74, %c0_75, %c8] : memref<2x8x32xf32, #tpu.memory_space<vmem>>, vector<2x8x8xf32>
    tpu.vector_store %arg15[%c0_74, %c0_75, %c8], %155 {strides = array<i32>} : memref<2x8x32xf32, #tpu.memory_space<vmem>>, vector<2x8x8xf32>,
    %157 = vector.extract_strided_slice %111 {offsets = [0, 0, 16], sizes = [2, 8, 8], strides = [1, 1, 1]} : vector<2x8x32xf32> to vector<2x8x8xf32>
    %158 = vector.extract_strided_slice %112 {offsets = [0, 0, 16], sizes = [2, 8, 8], strides = [1, 1, 1]} : vector<2x8x64xf32> to vector<2x8x8xf32>
    %159 = vector.extract_strided_slice %112 {offsets = [0, 0, 48], sizes = [2, 8, 8], strides = [1, 1, 1]} : vector<2x8x64xf32> to vector<2x8x8xf32>
    %160 = arith.truncf %157 : vector<2x8x8xf32> to vector<2x8x8xbf16>
    %161 = arith.truncf %158 : vector<2x8x8xf32> to vector<2x8x8xbf16>
    "tpu.trace_start"() <{level = 10 : i32, message = "bqe,bke->bqk"}> : () -> ()
    %cst_76 = arith.constant dense<0.000000e+00> : vector<2x8x8xf32>
    %162 = tpu.matmul %160, %161, %cst_76 {dimension_numbers = #tpu.dot_dimension_numbers<[2], [2], [1], [1], [0, 0, 0, 1, 1, 1], [0], [0]>} : vector<2x8x8xbf16>, vector<2x8x8xbf16>, vector<2x8x8xf32> -> vector<2x8x8xf32>
    "tpu.trace_stop"() : () -> ()
    %163 = vector.broadcast %5 : vector<2x1x8xf32> to vector<2x8x8xf32>
    %164 = arith.addf %162, %163 : vector<2x8x8xf32>
    %cst_77 = arith.constant dense<0xFF800000> : vector<2x8xf32>
    %165 = vector.multi_reduction <maximumf>, %164, %cst_77 [2] : vector<2x8x8xf32> to vector<2x8xf32>
    %166 = vector.shape_cast %165 : vector<2x8xf32> to vector<2x8x1xf32>
    %167 = vector.broadcast %166 : vector<2x8x1xf32> to vector<2x8x8xf32>
    %168 = arith.subf %164, %167 : vector<2x8x8xf32>
    %169 = math.exp %168 : vector<2x8x8xf32>
    %cst_78 = arith.constant dense<0.000000e+00> : vector<2x8xf32>
    %170 = vector.multi_reduction <add>, %169, %cst_78 [2] : vector<2x8x8xf32> to vector<2x8xf32>
    %171 = vector.shape_cast %170 : vector<2x8xf32> to vector<2x8x1xf32>
    %172 = tpu.reciprocal %171 {approx = true} : vector<2x8x1xf32> -> vector<2x8x1xf32>
    %173 = vector.broadcast %172 : vector<2x8x1xf32> to vector<2x8x8xf32>
    %174 = arith.mulf %169, %173 : vector<2x8x8xf32>
    %175 = arith.truncf %174 : vector<2x8x8xf32> to vector<2x8x8xbf16>
    %176 = arith.truncf %159 : vector<2x8x8xf32> to vector<2x8x8xbf16>
    "tpu.trace_start"() <{level = 10 : i32, message = "bqk,bke->bqe"}> : () -> ()
    %cst_79 = arith.constant dense<0.000000e+00> : vector<2x8x8xf32>
    %177 = tpu.matmul %175, %176, %cst_79 {dimension_numbers = #tpu.dot_dimension_numbers<[2], [1], [1], [2], [0, 0, 0, 1, 1, 2], [0], [0]>} : vector<2x8x8xbf16>, vector<2x8x8xbf16>, vector<2x8x8xf32> -> vector<2x8x8xf32>
    "tpu.trace_stop"() : () -> ()
    %c0_80 = arith.constant 0 : index
    %c0_81 = arith.constant 0 : index
    %c16 = arith.constant 16 : index
    %178 = vector.load %arg15[%c0_80, %c0_81, %c16] : memref<2x8x32xf32, #tpu.memory_space<vmem>>, vector<2x8x8xf32>
    tpu.vector_store %arg15[%c0_80, %c0_81, %c16], %177 {strides = array<i32>} : memref<2x8x32xf32, #tpu.memory_space<vmem>>, vector<2x8x8xf32>,
    %179 = vector.extract_strided_slice %111 {offsets = [0, 0, 24], sizes = [2, 8, 8], strides = [1, 1, 1]} : vector<2x8x32xf32> to vector<2x8x8xf32>
    %180 = vector.extract_strided_slice %112 {offsets = [0, 0, 24], sizes = [2, 8, 8], strides = [1, 1, 1]} : vector<2x8x64xf32> to vector<2x8x8xf32>
    %181 = vector.extract_strided_slice %112 {offsets = [0, 0, 56], sizes = [2, 8, 8], strides = [1, 1, 1]} : vector<2x8x64xf32> to vector<2x8x8xf32>
    %182 = arith.truncf %179 : vector<2x8x8xf32> to vector<2x8x8xbf16>
    %183 = arith.truncf %180 : vector<2x8x8xf32> to vector<2x8x8xbf16>
    "tpu.trace_start"() <{level = 10 : i32, message = "bqe,bke->bqk"}> : () -> ()
    %cst_82 = arith.constant dense<0.000000e+00> : vector<2x8x8xf32>
    %184 = tpu.matmul %182, %183, %cst_82 {dimension_numbers = #tpu.dot_dimension_numbers<[2], [2], [1], [1], [0, 0, 0, 1, 1, 1], [0], [0]>} : vector<2x8x8xbf16>, vector<2x8x8xbf16>, vector<2x8x8xf32> -> vector<2x8x8xf32>
    "tpu.trace_stop"() : () -> ()
    %185 = vector.broadcast %5 : vector<2x1x8xf32> to vector<2x8x8xf32>
    %186 = arith.addf %184, %185 : vector<2x8x8xf32>
    %cst_83 = arith.constant dense<0xFF800000> : vector<2x8xf32>
    %187 = vector.multi_reduction <maximumf>, %186, %cst_83 [2] : vector<2x8x8xf32> to vector<2x8xf32>
    %188 = vector.shape_cast %187 : vector<2x8xf32> to vector<2x8x1xf32>
    %189 = vector.broadcast %188 : vector<2x8x1xf32> to vector<2x8x8xf32>
    %190 = arith.subf %186, %189 : vector<2x8x8xf32>
    %191 = math.exp %190 : vector<2x8x8xf32>
    %cst_84 = arith.constant dense<0.000000e+00> : vector<2x8xf32>
    %192 = vector.multi_reduction <add>, %191, %cst_84 [2] : vector<2x8x8xf32> to vector<2x8xf32>
    %193 = vector.shape_cast %192 : vector<2x8xf32> to vector<2x8x1xf32>
    %194 = tpu.reciprocal %193 {approx = true} : vector<2x8x1xf32> -> vector<2x8x1xf32>
    %195 = vector.broadcast %194 : vector<2x8x1xf32> to vector<2x8x8xf32>
    %196 = arith.mulf %191, %195 : vector<2x8x8xf32>
    %197 = arith.truncf %196 : vector<2x8x8xf32> to vector<2x8x8xbf16>
    %198 = arith.truncf %181 : vector<2x8x8xf32> to vector<2x8x8xbf16>
    "tpu.trace_start"() <{level = 10 : i32, message = "bqk,bke->bqe"}> : () -> ()
    %cst_85 = arith.constant dense<0.000000e+00> : vector<2x8x8xf32>
    %199 = tpu.matmul %197, %198, %cst_85 {dimension_numbers = #tpu.dot_dimension_numbers<[2], [1], [1], [2], [0, 0, 0, 1, 1, 2], [0], [0]>} : vector<2x8x8xbf16>, vector<2x8x8xbf16>, vector<2x8x8xf32> -> vector<2x8x8xf32>
    "tpu.trace_stop"() : () -> ()
    %c0_86 = arith.constant 0 : index
    %c0_87 = arith.constant 0 : index
    %c24 = arith.constant 24 : index
    %200 = vector.load %arg15[%c0_86, %c0_87, %c24] : memref<2x8x32xf32, #tpu.memory_space<vmem>>, vector<2x8x8xf32>
    tpu.vector_store %arg15[%c0_86, %c0_87, %c24], %199 {strides = array<i32>} : memref<2x8x32xf32, #tpu.memory_space<vmem>>, vector<2x8x8xf32>,
    %c0_88 = arith.constant 0 : index
    %c0_89 = arith.constant 0 : index
    %c0_90 = arith.constant 0 : index
    %201 = vector.load %arg15[%c0_88, %c0_89, %c0_90] : memref<2x8x32xf32, #tpu.memory_space<vmem>>, vector<2x8x32xf32>
    %202 = vector.shape_cast %201 : vector<2x8x32xf32> to vector<16x32xf32>
    %203 = arith.truncf %202 : vector<16x32xf32> to vector<16x32xbf16>
    %c0_91 = arith.constant 0 : index
    %c0_92 = arith.constant 0 : index
    %c0_93 = arith.constant 0 : index
    %204 = vector.load %arg12[%c0_91, %c0_92, %c0_93] : memref<2x32x32xbf16, #tpu.memory_space<vmem>>, vector<1x32x32xbf16>
    %205 = vector.shape_cast %204 : vector<1x32x32xbf16> to vector<32x32xbf16>
    %cst_94 = arith.constant dense<0.000000e+00> : vector<16x32xf32>
    %206 = tpu.matmul %203, %205, %cst_94 {dimension_numbers = #tpu.dot_dimension_numbers<[1], [0], [0], [1], [0, 0, 1, 1], [], []>} : vector<16x32xbf16>, vector<32x32xbf16>, vector<16x32xf32> -> vector<16x32xf32>
    %c0_95 = arith.constant 0 : index
    %c96 = arith.constant 96 : index
    %207 = vector.load %arg13[%c0_95, %c96] : memref<2x128xf32, #tpu.memory_space<vmem>>, vector<1x32xf32>
    %208 = vector.broadcast %207 : vector<1x32xf32> to vector<16x32xf32>
    %209 = arith.addf %206, %208 : vector<16x32xf32>
    %210 = vector.shape_cast %209 : vector<16x32xf32> to vector<2x8x32xf32>
    %211 = arith.addf %73, %210 : vector<2x8x32xf32>
    %c0_96 = arith.constant 0 : index
    %c0_97 = arith.constant 0 : index
    %c0_98 = arith.constant 0 : index
    %c0_99 = arith.constant 0 : index
    %212 = vector.load %arg14[%c0_96, %c0_97, %c0_98, %c0_99] : memref<2x2x8x32xf32, #tpu.memory_space<vmem>>, vector<1x2x8x32xf32>
    %213 = vector.shape_cast %212 : vector<1x2x8x32xf32> to vector<2x8x32xf32>
    %214 = vector.shape_cast %211 : vector<2x8x32xf32> to vector<1x2x8x32xf32>
    tpu.vector_store %arg14[%c0_96, %c0_97, %c0_98, %c0_99], %214 {strides = array<i32>} : memref<2x2x8x32xf32, #tpu.memory_space<vmem>>, vector<1x2x8x32xf32>,
    %215 = vector.shape_cast %94 : vector<2x8x32xf32> to vector<16x32xf32>
    %216 = arith.truncf %215 : vector<16x32xf32> to vector<16x32xbf16>
    %c1_100 = arith.constant 1 : index
    %c0_101 = arith.constant 0 : index
    %c0_102 = arith.constant 0 : index
    %217 = vector.load %arg10[%c1_100, %c0_101, %c0_102] : memref<2x32x32xbf16, #tpu.memory_space<vmem>>, vector<1x32x32xbf16>
    %218 = vector.shape_cast %217 : vector<1x32x32xbf16> to vector<32x32xbf16>
    %cst_103 = arith.constant dense<0.000000e+00> : vector<16x32xf32>
    %219 = tpu.matmul %216, %218, %cst_103 {dimension_numbers = #tpu.dot_dimension_numbers<[1], [0], [0], [1], [0, 0, 1, 1], [], []>} : vector<16x32xbf16>, vector<32x32xbf16>, vector<16x32xf32> -> vector<16x32xf32>
    %c1_104 = arith.constant 1 : index
    %c0_105 = arith.constant 0 : index
    %220 = vector.load %arg13[%c1_104, %c0_105] : memref<2x128xf32, #tpu.memory_space<vmem>>, vector<1x32xf32>
    %221 = vector.broadcast %220 : vector<1x32xf32> to vector<16x32xf32>
    %222 = arith.addf %219, %221 : vector<16x32xf32>
    %223 = vector.shape_cast %211 : vector<2x8x32xf32> to vector<16x32xf32>
    %224 = arith.truncf %223 : vector<16x32xf32> to vector<16x32xbf16>
    %c1_106 = arith.constant 1 : index
    %c0_107 = arith.constant 0 : index
    %c0_108 = arith.constant 0 : index
    %225 = vector.load %arg11[%c1_106, %c0_107, %c0_108] : memref<2x32x64xbf16, #tpu.memory_space<vmem>>, vector<1x32x64xbf16>
    %226 = vector.shape_cast %225 : vector<1x32x64xbf16> to vector<32x64xbf16>
    %cst_109 = arith.constant dense<0.000000e+00> : vector<16x64xf32>
    %227 = tpu.matmul %224, %226, %cst_109 {dimension_numbers = #tpu.dot_dimension_numbers<[1], [0], [0], [1], [0, 0, 1, 1], [], []>} : vector<16x32xbf16>, vector<32x64xbf16>, vector<16x64xf32> -> vector<16x64xf32>
    %c1_110 = arith.constant 1 : index
    %c32_111 = arith.constant 32 : index
    %228 = vector.load %arg13[%c1_110, %c32_111] : memref<2x128xf32, #tpu.memory_space<vmem>>, vector<1x64xf32>
    %229 = vector.broadcast %228 : vector<1x64xf32> to vector<16x64xf32>
    %230 = arith.addf %227, %229 : vector<16x64xf32>
    %231 = vector.shape_cast %222 : vector<16x32xf32> to vector<2x8x32xf32>
    %232 = vector.shape_cast %230 : vector<16x64xf32> to vector<2x8x64xf32>
    %233 = vector.extract_strided_slice %231 {offsets = [0, 0, 0], sizes = [2, 8, 8], strides = [1, 1, 1]} : vector<2x8x32xf32> to vector<2x8x8xf32>
    %234 = vector.extract_strided_slice %232 {offsets = [0, 0, 0], sizes = [2, 8, 8], strides = [1, 1, 1]} : vector<2x8x64xf32> to vector<2x8x8xf32>
    %235 = vector.extract_strided_slice %232 {offsets = [0, 0, 32], sizes = [2, 8, 8], strides = [1, 1, 1]} : vector<2x8x64xf32> to vector<2x8x8xf32>
    %236 = arith.truncf %233 : vector<2x8x8xf32> to vector<2x8x8xbf16>
    %237 = arith.truncf %234 : vector<2x8x8xf32> to vector<2x8x8xbf16>
    "tpu.trace_start"() <{level = 10 : i32, message = "bqe,bke->bqk"}> : () -> ()
    %cst_112 = arith.constant dense<0.000000e+00> : vector<2x8x8xf32>
    %238 = tpu.matmul %236, %237, %cst_112 {dimension_numbers = #tpu.dot_dimension_numbers<[2], [2], [1], [1], [0, 0, 0, 1, 1, 1], [0], [0]>} : vector<2x8x8xbf16>, vector<2x8x8xbf16>, vector<2x8x8xf32> -> vector<2x8x8xf32>
    "tpu.trace_stop"() : () -> ()
    %239 = vector.broadcast %5 : vector<2x1x8xf32> to vector<2x8x8xf32>
    %240 = arith.addf %238, %239 : vector<2x8x8xf32>
    %cst_113 = arith.constant dense<0xFF800000> : vector<2x8xf32>
    %241 = vector.multi_reduction <maximumf>, %240, %cst_113 [2] : vector<2x8x8xf32> to vector<2x8xf32>
    %242 = vector.shape_cast %241 : vector<2x8xf32> to vector<2x8x1xf32>
    %243 = vector.broadcast %242 : vector<2x8x1xf32> to vector<2x8x8xf32>
    %244 = arith.subf %240, %243 : vector<2x8x8xf32>
    %245 = math.exp %244 : vector<2x8x8xf32>
    %cst_114 = arith.constant dense<0.000000e+00> : vector<2x8xf32>
    %246 = vector.multi_reduction <add>, %245, %cst_114 [2] : vector<2x8x8xf32> to vector<2x8xf32>
    %247 = vector.shape_cast %246 : vector<2x8xf32> to vector<2x8x1xf32>
    %248 = tpu.reciprocal %247 {approx = true} : vector<2x8x1xf32> -> vector<2x8x1xf32>
    %249 = vector.broadcast %248 : vector<2x8x1xf32> to vector<2x8x8xf32>
    %250 = arith.mulf %245, %249 : vector<2x8x8xf32>
    %251 = arith.truncf %250 : vector<2x8x8xf32> to vector<2x8x8xbf16>
    %252 = arith.truncf %235 : vector<2x8x8xf32> to vector<2x8x8xbf16>
    "tpu.trace_start"() <{level = 10 : i32, message = "bqk,bke->bqe"}> : () -> ()
    %cst_115 = arith.constant dense<0.000000e+00> : vector<2x8x8xf32>
    %253 = tpu.matmul %251, %252, %cst_115 {dimension_numbers = #tpu.dot_dimension_numbers<[2], [1], [1], [2], [0, 0, 0, 1, 1, 2], [0], [0]>} : vector<2x8x8xbf16>, vector<2x8x8xbf16>, vector<2x8x8xf32> -> vector<2x8x8xf32>
    "tpu.trace_stop"() : () -> ()
    %c0_116 = arith.constant 0 : index
    %c0_117 = arith.constant 0 : index
    %c0_118 = arith.constant 0 : index
    %254 = vector.load %arg15[%c0_116, %c0_117, %c0_118] : memref<2x8x32xf32, #tpu.memory_space<vmem>>, vector<2x8x8xf32>
    tpu.vector_store %arg15[%c0_116, %c0_117, %c0_118], %253 {strides = array<i32>} : memref<2x8x32xf32, #tpu.memory_space<vmem>>, vector<2x8x8xf32>,
    %255 = vector.extract_strided_slice %231 {offsets = [0, 0, 8], sizes = [2, 8, 8], strides = [1, 1, 1]} : vector<2x8x32xf32> to vector<2x8x8xf32>
    %256 = vector.extract_strided_slice %232 {offsets = [0, 0, 8], sizes = [2, 8, 8], strides = [1, 1, 1]} : vector<2x8x64xf32> to vector<2x8x8xf32>
    %257 = vector.extract_strided_slice %232 {offsets = [0, 0, 40], sizes = [2, 8, 8], strides = [1, 1, 1]} : vector<2x8x64xf32> to vector<2x8x8xf32>
    %258 = arith.truncf %255 : vector<2x8x8xf32> to vector<2x8x8xbf16>
    %259 = arith.truncf %256 : vector<2x8x8xf32> to vector<2x8x8xbf16>
    "tpu.trace_start"() <{level = 10 : i32, message = "bqe,bke->bqk"}> : () -> ()
    %cst_119 = arith.constant dense<0.000000e+00> : vector<2x8x8xf32>
    %260 = tpu.matmul %258, %259, %cst_119 {dimension_numbers = #tpu.dot_dimension_numbers<[2], [2], [1], [1], [0, 0, 0, 1, 1, 1], [0], [0]>} : vector<2x8x8xbf16>, vector<2x8x8xbf16>, vector<2x8x8xf32> -> vector<2x8x8xf32>
    "tpu.trace_stop"() : () -> ()
    %261 = vector.broadcast %5 : vector<2x1x8xf32> to vector<2x8x8xf32>
    %262 = arith.addf %260, %261 : vector<2x8x8xf32>
    %cst_120 = arith.constant dense<0xFF800000> : vector<2x8xf32>
    %263 = vector.multi_reduction <maximumf>, %262, %cst_120 [2] : vector<2x8x8xf32> to vector<2x8xf32>
    %264 = vector.shape_cast %263 : vector<2x8xf32> to vector<2x8x1xf32>
    %265 = vector.broadcast %264 : vector<2x8x1xf32> to vector<2x8x8xf32>
    %266 = arith.subf %262, %265 : vector<2x8x8xf32>
    %267 = math.exp %266 : vector<2x8x8xf32>
    %cst_121 = arith.constant dense<0.000000e+00> : vector<2x8xf32>
    %268 = vector.multi_reduction <add>, %267, %cst_121 [2] : vector<2x8x8xf32> to vector<2x8xf32>
    %269 = vector.shape_cast %268 : vector<2x8xf32> to vector<2x8x1xf32>
    %270 = tpu.reciprocal %269 {approx = true} : vector<2x8x1xf32> -> vector<2x8x1xf32>
    %271 = vector.broadcast %270 : vector<2x8x1xf32> to vector<2x8x8xf32>
    %272 = arith.mulf %267, %271 : vector<2x8x8xf32>
    %273 = arith.truncf %272 : vector<2x8x8xf32> to vector<2x8x8xbf16>
    %274 = arith.truncf %257 : vector<2x8x8xf32> to vector<2x8x8xbf16>
    "tpu.trace_start"() <{level = 10 : i32, message = "bqk,bke->bqe"}> : () -> ()
    %cst_122 = arith.constant dense<0.000000e+00> : vector<2x8x8xf32>
    %275 = tpu.matmul %273, %274, %cst_122 {dimension_numbers = #tpu.dot_dimension_numbers<[2], [1], [1], [2], [0, 0, 0, 1, 1, 2], [0], [0]>} : vector<2x8x8xbf16>, vector<2x8x8xbf16>, vector<2x8x8xf32> -> vector<2x8x8xf32>
    "tpu.trace_stop"() : () -> ()
    %c0_123 = arith.constant 0 : index
    %c0_124 = arith.constant 0 : index
    %c8_125 = arith.constant 8 : index
    %276 = vector.load %arg15[%c0_123, %c0_124, %c8_125] : memref<2x8x32xf32, #tpu.memory_space<vmem>>, vector<2x8x8xf32>
    tpu.vector_store %arg15[%c0_123, %c0_124, %c8_125], %275 {strides = array<i32>} : memref<2x8x32xf32, #tpu.memory_space<vmem>>, vector<2x8x8xf32>,
    %277 = vector.extract_strided_slice %231 {offsets = [0, 0, 16], sizes = [2, 8, 8], strides = [1, 1, 1]} : vector<2x8x32xf32> to vector<2x8x8xf32>
    %278 = vector.extract_strided_slice %232 {offsets = [0, 0, 16], sizes = [2, 8, 8], strides = [1, 1, 1]} : vector<2x8x64xf32> to vector<2x8x8xf32>
    %279 = vector.extract_strided_slice %232 {offsets = [0, 0, 48], sizes = [2, 8, 8], strides = [1, 1, 1]} : vector<2x8x64xf32> to vector<2x8x8xf32>
    %280 = arith.truncf %277 : vector<2x8x8xf32> to vector<2x8x8xbf16>
    %281 = arith.truncf %278 : vector<2x8x8xf32> to vector<2x8x8xbf16>
    "tpu.trace_start"() <{level = 10 : i32, message = "bqe,bke->bqk"}> : () -> ()
    %cst_126 = arith.constant dense<0.000000e+00> : vector<2x8x8xf32>
    %282 = tpu.matmul %280, %281, %cst_126 {dimension_numbers = #tpu.dot_dimension_numbers<[2], [2], [1], [1], [0, 0, 0, 1, 1, 1], [0], [0]>} : vector<2x8x8xbf16>, vector<2x8x8xbf16>, vector<2x8x8xf32> -> vector<2x8x8xf32>
    "tpu.trace_stop"() : () -> ()
    %283 = vector.broadcast %5 : vector<2x1x8xf32> to vector<2x8x8xf32>
    %284 = arith.addf %282, %283 : vector<2x8x8xf32>
    %cst_127 = arith.constant dense<0xFF800000> : vector<2x8xf32>
    %285 = vector.multi_reduction <maximumf>, %284, %cst_127 [2] : vector<2x8x8xf32> to vector<2x8xf32>
    %286 = vector.shape_cast %285 : vector<2x8xf32> to vector<2x8x1xf32>
    %287 = vector.broadcast %286 : vector<2x8x1xf32> to vector<2x8x8xf32>
    %288 = arith.subf %284, %287 : vector<2x8x8xf32>
    %289 = math.exp %288 : vector<2x8x8xf32>
    %cst_128 = arith.constant dense<0.000000e+00> : vector<2x8xf32>
    %290 = vector.multi_reduction <add>, %289, %cst_128 [2] : vector<2x8x8xf32> to vector<2x8xf32>
    %291 = vector.shape_cast %290 : vector<2x8xf32> to vector<2x8x1xf32>
    %292 = tpu.reciprocal %291 {approx = true} : vector<2x8x1xf32> -> vector<2x8x1xf32>
    %293 = vector.broadcast %292 : vector<2x8x1xf32> to vector<2x8x8xf32>
    %294 = arith.mulf %289, %293 : vector<2x8x8xf32>
    %295 = arith.truncf %294 : vector<2x8x8xf32> to vector<2x8x8xbf16>
    %296 = arith.truncf %279 : vector<2x8x8xf32> to vector<2x8x8xbf16>
    "tpu.trace_start"() <{level = 10 : i32, message = "bqk,bke->bqe"}> : () -> ()
    %cst_129 = arith.constant dense<0.000000e+00> : vector<2x8x8xf32>
    %297 = tpu.matmul %295, %296, %cst_129 {dimension_numbers = #tpu.dot_dimension_numbers<[2], [1], [1], [2], [0, 0, 0, 1, 1, 2], [0], [0]>} : vector<2x8x8xbf16>, vector<2x8x8xbf16>, vector<2x8x8xf32> -> vector<2x8x8xf32>
    "tpu.trace_stop"() : () -> ()
    %c0_130 = arith.constant 0 : index
    %c0_131 = arith.constant 0 : index
    %c16_132 = arith.constant 16 : index
    %298 = vector.load %arg15[%c0_130, %c0_131, %c16_132] : memref<2x8x32xf32, #tpu.memory_space<vmem>>, vector<2x8x8xf32>
    tpu.vector_store %arg15[%c0_130, %c0_131, %c16_132], %297 {strides = array<i32>} : memref<2x8x32xf32, #tpu.memory_space<vmem>>, vector<2x8x8xf32>,
    %299 = vector.extract_strided_slice %231 {offsets = [0, 0, 24], sizes = [2, 8, 8], strides = [1, 1, 1]} : vector<2x8x32xf32> to vector<2x8x8xf32>
    %300 = vector.extract_strided_slice %232 {offsets = [0, 0, 24], sizes = [2, 8, 8], strides = [1, 1, 1]} : vector<2x8x64xf32> to vector<2x8x8xf32>
    %301 = vector.extract_strided_slice %232 {offsets = [0, 0, 56], sizes = [2, 8, 8], strides = [1, 1, 1]} : vector<2x8x64xf32> to vector<2x8x8xf32>
    %302 = arith.truncf %299 : vector<2x8x8xf32> to vector<2x8x8xbf16>
    %303 = arith.truncf %300 : vector<2x8x8xf32> to vector<2x8x8xbf16>
    "tpu.trace_start"() <{level = 10 : i32, message = "bqe,bke->bqk"}> : () -> ()
    %cst_133 = arith.constant dense<0.000000e+00> : vector<2x8x8xf32>
    %304 = tpu.matmul %302, %303, %cst_133 {dimension_numbers = #tpu.dot_dimension_numbers<[2], [2], [1], [1], [0, 0, 0, 1, 1, 1], [0], [0]>} : vector<2x8x8xbf16>, vector<2x8x8xbf16>, vector<2x8x8xf32> -> vector<2x8x8xf32>
    "tpu.trace_stop"() : () -> ()
    %305 = vector.broadcast %5 : vector<2x1x8xf32> to vector<2x8x8xf32>
    %306 = arith.addf %304, %305 : vector<2x8x8xf32>
    %cst_134 = arith.constant dense<0xFF800000> : vector<2x8xf32>
    %307 = vector.multi_reduction <maximumf>, %306, %cst_134 [2] : vector<2x8x8xf32> to vector<2x8xf32>
    %308 = vector.shape_cast %307 : vector<2x8xf32> to vector<2x8x1xf32>
    %309 = vector.broadcast %308 : vector<2x8x1xf32> to vector<2x8x8xf32>
    %310 = arith.subf %306, %309 : vector<2x8x8xf32>
    %311 = math.exp %310 : vector<2x8x8xf32>
    %cst_135 = arith.constant dense<0.000000e+00> : vector<2x8xf32>
    %312 = vector.multi_reduction <add>, %311, %cst_135 [2] : vector<2x8x8xf32> to vector<2x8xf32>
    %313 = vector.shape_cast %312 : vector<2x8xf32> to vector<2x8x1xf32>
    %314 = tpu.reciprocal %313 {approx = true} : vector<2x8x1xf32> -> vector<2x8x1xf32>
    %315 = vector.broadcast %314 : vector<2x8x1xf32> to vector<2x8x8xf32>
    %316 = arith.mulf %311, %315 : vector<2x8x8xf32>
    %317 = arith.truncf %316 : vector<2x8x8xf32> to vector<2x8x8xbf16>
    %318 = arith.truncf %301 : vector<2x8x8xf32> to vector<2x8x8xbf16>
    "tpu.trace_start"() <{level = 10 : i32, message = "bqk,bke->bqe"}> : () -> ()
    %cst_136 = arith.constant dense<0.000000e+00> : vector<2x8x8xf32>
    %319 = tpu.matmul %317, %318, %cst_136 {dimension_numbers = #tpu.dot_dimension_numbers<[2], [1], [1], [2], [0, 0, 0, 1, 1, 2], [0], [0]>} : vector<2x8x8xbf16>, vector<2x8x8xbf16>, vector<2x8x8xf32> -> vector<2x8x8xf32>
    "tpu.trace_stop"() : () -> ()
    %c0_137 = arith.constant 0 : index
    %c0_138 = arith.constant 0 : index
    %c24_139 = arith.constant 24 : index
    %320 = vector.load %arg15[%c0_137, %c0_138, %c24_139] : memref<2x8x32xf32, #tpu.memory_space<vmem>>, vector<2x8x8xf32>
    tpu.vector_store %arg15[%c0_137, %c0_138, %c24_139], %319 {strides = array<i32>} : memref<2x8x32xf32, #tpu.memory_space<vmem>>, vector<2x8x8xf32>,
    %c0_140 = arith.constant 0 : index
    %c0_141 = arith.constant 0 : index
    %c0_142 = arith.constant 0 : index
    %321 = vector.load %arg15[%c0_140, %c0_141, %c0_142] : memref<2x8x32xf32, #tpu.memory_space<vmem>>, vector<2x8x32xf32>
    %322 = vector.shape_cast %321 : vector<2x8x32xf32> to vector<16x32xf32>
    %323 = arith.truncf %322 : vector<16x32xf32> to vector<16x32xbf16>
    %c1_143 = arith.constant 1 : index
    %c0_144 = arith.constant 0 : index
    %c0_145 = arith.constant 0 : index
    %324 = vector.load %arg12[%c1_143, %c0_144, %c0_145] : memref<2x32x32xbf16, #tpu.memory_space<vmem>>, vector<1x32x32xbf16>
    %325 = vector.shape_cast %324 : vector<1x32x32xbf16> to vector<32x32xbf16>
    %cst_146 = arith.constant dense<0.000000e+00> : vector<16x32xf32>
    %326 = tpu.matmul %323, %325, %cst_146 {dimension_numbers = #tpu.dot_dimension_numbers<[1], [0], [0], [1], [0, 0, 1, 1], [], []>} : vector<16x32xbf16>, vector<32x32xbf16>, vector<16x32xf32> -> vector<16x32xf32>
    %c1_147 = arith.constant 1 : index
    %c96_148 = arith.constant 96 : index
    %327 = vector.load %arg13[%c1_147, %c96_148] : memref<2x128xf32, #tpu.memory_space<vmem>>, vector<1x32xf32>
    %328 = vector.broadcast %327 : vector<1x32xf32> to vector<16x32xf32>
    %329 = arith.addf %326, %328 : vector<16x32xf32>
    %330 = vector.shape_cast %329 : vector<16x32xf32> to vector<2x8x32xf32>
    %331 = arith.addf %94, %330 : vector<2x8x32xf32>
    %c1_149 = arith.constant 1 : index
    %c0_150 = arith.constant 0 : index
    %c0_151 = arith.constant 0 : index
    %c0_152 = arith.constant 0 : index
    %332 = vector.load %arg14[%c1_149, %c0_150, %c0_151, %c0_152] : memref<2x2x8x32xf32, #tpu.memory_space<vmem>>, vector<1x2x8x32xf32>
    %333 = vector.shape_cast %332 : vector<1x2x8x32xf32> to vector<2x8x32xf32>
    %334 = vector.shape_cast %331 : vector<2x8x32xf32> to vector<1x2x8x32xf32>
    tpu.vector_store %arg14[%c1_149, %c0_150, %c0_151, %c0_152], %334 {strides = array<i32>} : memref<2x2x8x32xf32, #tpu.memory_space<vmem>>, vector<1x2x8x32xf32>,
    return
  }
  func.func @transform_0(%arg0: i32) -> (i32, i32, i32, i32) {
    %c0_i32 = arith.constant 0 : i32
    %c0_i32_0 = arith.constant 0 : i32
    %c0_i32_1 = arith.constant 0 : i32
    %c0_i32_2 = arith.constant 0 : i32
    return %c0_i32, %arg0, %c0_i32_0, %c0_i32_1 : i32, i32, i32, i32
  }
  func.func @transform_1(%arg0: i32) -> (i32, i32, i32) {
    %c0_i32 = arith.constant 0 : i32
    %c0_i32_0 = arith.constant 0 : i32
    %c0_i32_1 = arith.constant 0 : i32
    return %arg0, %c0_i32, %c0_i32_0 : i32, i32, i32
  }
  func.func @transform_2(%arg0: i32) -> (i32, i32, i32) {
    %c0_i32 = arith.constant 0 : i32
    %c0_i32_0 = arith.constant 0 : i32
    %c0_i32_1 = arith.constant 0 : i32
    %c0_i32_2 = arith.constant 0 : i32
    return %c0_i32, %c0_i32_0, %c0_i32_1 : i32, i32, i32
  }
  func.func @transform_3(%arg0: i32) -> (i32, i32, i32) {
    %c0_i32 = arith.constant 0 : i32
    %c0_i32_0 = arith.constant 0 : i32
    %c0_i32_1 = arith.constant 0 : i32
    %c0_i32_2 = arith.constant 0 : i32
    return %c0_i32, %c0_i32_0, %c0_i32_1 : i32, i32, i32
  }
  func.func @transform_4(%arg0: i32) -> (i32, i32, i32) {
    %c0_i32 = arith.constant 0 : i32
    %c0_i32_0 = arith.constant 0 : i32
    %c0_i32_1 = arith.constant 0 : i32
    %c0_i32_2 = arith.constant 0 : i32
    return %c0_i32, %c0_i32_0, %c0_i32_1 : i32, i32, i32
  }
  func.func @transform_5(%arg0: i32) -> (i32, i32, i32) {
    %c0_i32 = arith.constant 0 : i32
    %c0_i32_0 = arith.constant 0 : i32
    %c0_i32_1 = arith.constant 0 : i32
    %c0_i32_2 = arith.constant 0 : i32
    return %c0_i32, %c0_i32_0, %c0_i32_1 : i32, i32, i32
  }
  func.func @transform_6(%arg0: i32) -> (i32, i32) {
    %c0_i32 = arith.constant 0 : i32
    %c0_i32_0 = arith.constant 0 : i32
    %c0_i32_1 = arith.constant 0 : i32
    return %c0_i32, %c0_i32_0 : i32, i32
  }
  func.func @transform_7(%arg0: i32) -> (i32, i32, i32) {
    %c0_i32 = arith.constant 0 : i32
    %c0_i32_0 = arith.constant 0 : i32
    %c0_i32_1 = arith.constant 0 : i32
    %c0_i32_2 = arith.constant 0 : i32
    return %c0_i32, %c0_i32_0, %c0_i32_1 : i32, i32, i32
  }
  func.func @transform_8(%arg0: i32) -> (i32, i32) {
    %c0_i32 = arith.constant 0 : i32
    %c0_i32_0 = arith.constant 0 : i32
    %c0_i32_1 = arith.constant 0 : i32
    return %c0_i32, %c0_i32_0 : i32, i32
  }
  func.func @transform_9(%arg0: i32) -> (i32, i32, i32) {
    %c0_i32 = arith.constant 0 : i32
    %c0_i32_0 = arith.constant 0 : i32
    %c0_i32_1 = arith.constant 0 : i32
    %c0_i32_2 = arith.constant 0 : i32
    return %c0_i32, %c0_i32_0, %c0_i32_1 : i32, i32, i32
  }
  func.func @transform_10(%arg0: i32) -> (i32, i32, i32) {
    %c0_i32 = arith.constant 0 : i32
    %c0_i32_0 = arith.constant 0 : i32
    %c0_i32_1 = arith.constant 0 : i32
    %c0_i32_2 = arith.constant 0 : i32
    return %c0_i32, %c0_i32_0, %c0_i32_1 : i32, i32, i32
  }
  func.func @transform_11(%arg0: i32) -> (i32, i32, i32) {
    %c0_i32 = arith.constant 0 : i32
    %c0_i32_0 = arith.constant 0 : i32
    %c0_i32_1 = arith.constant 0 : i32
    %c0_i32_2 = arith.constant 0 : i32
    return %c0_i32, %c0_i32_0, %c0_i32_1 : i32, i32, i32
  }
  func.func @transform_12(%arg0: i32) -> (i32, i32) {
    %c0_i32 = arith.constant 0 : i32
    %c0_i32_0 = arith.constant 0 : i32
    %c0_i32_1 = arith.constant 0 : i32
    return %c0_i32, %c0_i32_0 : i32, i32
  }
  func.func @transform_13(%arg0: i32) -> (i32, i32, i32, i32) {
    %c0_i32 = arith.constant 0 : i32
    %c0_i32_0 = arith.constant 0 : i32
    %c0_i32_1 = arith.constant 0 : i32
    %c0_i32_2 = arith.constant 0 : i32
    return %c0_i32, %arg0, %c0_i32_0, %c0_i32_1 : i32, i32, i32, i32
  }
}

</mosaic_0001>

<bundles_post_ra>
// kernel: keypoints_encoder_layer.1
= control target key start
LH: loop header
LB: loop body
LE: loop exit
PB: predicated region body
PF: predicated region fallthrough
CT: control target
= control target key end

     0   :  { %18 = vsyncpa [#allocation4], 0  ;;  %s4267_s0 = inlined_call_operand.vmem [shape: f32[2,2,8,2], index: 0, kind: input, shape index: {}]   ;;  %s4268_s1 = inlined_call_operand.hbm [shape: f32[2,1,8], index: 1, kind: input, shape index: {}]   ;;  %s4269_s2 = inlined_call_operand.vmem [shape: f32[2,2,32], index: 2, kind: input, shape index: {}]   ;;  %s4270_s3 = inlined_call_operand.hbm [shape: f32[2,8,32], index: 3, kind: input, shape index: {}]   ;;  %s4271_s4 = inlined_call_operand.vmem [shape: f32[2,2,32], index: 4, kind: input, shape index: {}]   ;;  %s4272_s5 = inlined_call_operand.vmem [shape: bf16[2,32,64], index: 5, kind: input, shape index: {}]   ;;  %s4273_s6 = inlined_call_operand.vmem [shape: f32[2,64], index: 6, kind: input, shape index: {}]   ;;  %s4274_s7 = inlined_call_operand.vmem [shape: bf16[2,64,32], index: 7, kind: input, shape index: {}]   ;;  %s4275_s8 = inlined_call_operand.vmem [shape: f32[2,32], index: 8, kind: input, shape index: {}]   ;;  %s4276_s9 = inlined_call_operand.vmem [shape: bf16[2,32,32], index: 9, kind: input, shape index: {}]   ;;  %s4277_s10 = inlined_call_operand.vmem [shape: bf16[2,32,64], index: 10, kind: input, shape index: {}]   ;;  %s4278_s11 = inlined_call_operand.vmem [shape: bf16[2,32,32], index: 11, kind: input, shape index: {}]   ;;  %s4279_s12 = inlined_call_operand.hbm [shape: f32[2,128], index: 12, kind: input, shape index: {}]   ;;  %s4280_s13 = inlined_call_operand.vmem [shape: f32[2,2,8,32], index: 13, kind: output, shape index: {}]  }
   0x1   :  { %19 = vsyncpa [#allocation6], 0  ;;  %s3538_s25 = smov [#allocation5]  }
   0x2   :  { %s41_s26 = sshll.u32 %s3538_s25, 4  ;;  %s42_s26 = int_to_ptr.vmem [resolvable:$true] %s41_s26 }
   0x3   :  { %s3482_s27 = scalar_lea.vmem %s42_s26, 256  ;;  %p3487_p1 = scmp.lt.s32.totalorder %s42_s26, %s42_s26 }
   0x4   :  { %p3483_p0 = scmp.ne.s32.totalorder %s42_s26, %s3482_s27  ;;  %p3488_p2 = scmp.lt.s32.totalorder %s3482_s27, %s3482_s27 }
   0x6   :  { %p3489_p3 = por %p3488_p2, %p3487_p1 }
   0x8   :  { %p3490_p4 = pnand %p3489_p3, %p3483_p0 }
   0xa   :  { %3493 = shalt.err (!%p3490_p4)
}
   0xb   :  { %s3539_s28 = smov 128   ;;  %s3540_s29 = smov 8  }
   0xc   :  { %47 = dma.hbm_to_vmem [thread:$0]  %s4270_s3, 256, %s42_s26, [#allocation6], %s3539_s28, %s3539_s28, %s3540_s29  }
   0xd   :  { %s3541_s15 = smov [#allocation3]  }
   0xe   :  { %s27_s16 = sshll.u32 %s3541_s15, 4  ;;  %s28_s16 = int_to_ptr.vmem [resolvable:$true] %s27_s16 }
   0xf   :  { %s3502_s17 = scalar_lea.vmem %s28_s16, 32  ;;  %p3507_p6 = scmp.lt.s32.totalorder %s28_s16, %s28_s16 }
  0x10   :  { %p3503_p5 = scmp.ne.s32.totalorder %s28_s16, %s3502_s17  ;;  %p3508_p7 = scmp.lt.s32.totalorder %s3502_s17, %s3502_s17 }
  0x12   :  { %p3509_p8 = por %p3508_p7, %p3507_p6 }
  0x14   :  { %p3510_p9 = pnand %p3509_p8, %p3503_p5 }
  0x16   :  { %3513 = shalt.err (!%p3510_p9)
}
  0x17   :  { %s3542_s18 = smov 16   ;;  %s3543_s19 = smov 1  }
  0x18   :  { %33 = dma.hbm_to_vmem [thread:$0]  %s4268_s1, 32, %s28_s16, [#allocation4], %s3542_s18, %s3542_s18, %s3543_s19  }
  0x19   :  { %s3544_s22 = smov [#allocation7]  }
  0x1a   :  { %s70_s3 = sshll.u32 %s3544_s22, 4  ;;  %s71_s3 = int_to_ptr.vmem [resolvable:$true] %s70_s3 }
  0x1b   :  { %s3522_s23 = scalar_lea.vmem %s71_s3, 32  ;;  %p3527_p11 = scmp.lt.s32.totalorder %s71_s3, %s71_s3 }
  0x1c   :  { %p3523_p10 = scmp.ne.s32.totalorder %s71_s3, %s3522_s23  ;;  %p3528_p12 = scmp.lt.s32.totalorder %s3522_s23, %s3522_s23 }
  0x1e   :  { %p3529_p13 = por %p3528_p12, %p3527_p11 }
  0x20   :  { %p3530_p0 = pnand %p3529_p13, %p3523_p10 }
  0x22   :  { %3533 = shalt.err (!%p3530_p0)
}
  0x23   :  { %73 = dma.hbm_to_vmem [thread:$0]  %s4279_s12, 32, %s71_s3, [#allocation6]  }
  0x24   :  { %3534 = dma.done.wait [#allocation4], 32  }
  0x25   :  { %3535 = vsyncadd [#allocation4], 4294967264 }
  0x26   :  { %3536 = dma.done.wait [#allocation6], 288  }
  0x27   :  { %3537 = vsyncadd [#allocation6], 4294967008  ;;  %v3545_v0 = vmov 1   ;;  %v3546_v1 = vmov 0   ;;  %v84_v2 = vld [vmem:[%s4267_s0] sm:$0xff]  ;;  %v85_v3 = vld [vmem:[%s4267_s0 + $0x8] sm:$0xff] }
  0x28   :  { %3374 = vset.pattern.permute.xlu1 %v3545_v0  ;;  %3373 = vset.pattern.permute.xlu0 %v3546_v1  ;;  %v86_v4 = vld [vmem:[%s4267_s0 + $0x10] sm:$0xff]  ;;  %v87_v5 = vld [vmem:[%s4267_s0 + $0x18] sm:$0xff]  ;;  %v2867_v6 = vld [vmem:[%s4269_s2] ss:$0 sm:$0xff]  ;;  %vm217_vm0 = vcmask 261120   ;;  %v3547_v61 = vmov 0.0  }
  0x29   :  { %137 = vperm.xlu1 %3374, %v84_v2   ;;  %100 = vperm.xlu0 %3373, %v84_v2   ;;  %v2869_v7 = vld [vmem:[%s4269_s2 + $0x1] ss:$0 sm:$0xff]  ;;  %v94_v9 = vld [vmem:[#allocation5] sm:$0xff]  ;;  %v2868_v21 = vld [vmem:[%s4269_s2 + $0x2] ss:$0 sm:$0xff]  ;;  %vm3548_vm1 = vmmov 0  }
  0x2a   :  { %v95_v26 = vld [vmem:[#allocation5 + $0x8] sm:$0xff]  ;;  %v2870_v29 = vld [vmem:[%s4269_s2 + $0x3] ss:$0 sm:$0xff]  ;;  %v3378_v60 = vld [vmem:[%s4272_s5 + $0x8] sm:$0xff]   ;;  %3072 = vmatprep.subr.bf16.mxu0 %v3547_v61  ;;  %3080 = vmatprep.subr.bf16.mxu1 %v3547_v61  ;;  %vm405_vm2 = vcmask 523264   ;;  %s3550_s15 = smov 96  }
  0x2b   :  { %3073 = vmatpush3.bf16.msra.mxu0 %v3378_v60  ;;  %v3379_v62 = vld [vmem:[%s4272_s5] sm:$0xff]   ;;  %3076 = vmatprep.mubr.msk.bf16.mxu0 %vm3548_vm1, %v3547_v61  ;;  %v3382_v63 = vld [vmem:[%s4274_s7 + $0x18] sm:$0xff]   ;;  %vm753_vm3 = vcmask 64512   ;;  %vm876_vm4 = vcmask 1043456   ;;  %s3552_s3 = smov 88   ;;  %s3553_s2 = smov 112  }
  0x2c   :  { %3074 = vmatprep.subr.bf16.mxu0 %v3547_v61  ;;  %3088 = vmatprep.mubr.msk.bf16.mxu1 %vm3548_vm1, %v3547_v61  ;;  %s3554_s23 = smov 80   ;;  %s3555_s24 = smov 104   ;;  %vm1201_vm5 = vcmask 130112   ;;  %vm1432_vm6 = vcmask 195712   ;;  %vm1663_vm7 = vcmask 261312  }
  0x2d   :  { %141 = vperm.xlu1 %3374, %v85_v3   ;;  %105 = vperm.xlu0 %3373, %v85_v3   ;;  %v3549_v3 = vmov 1966171168   ;;  %s3556_s25 = smov 72  }
  0x2e   :  { %3081 = vmatpush3.bf16.msra.mxu1 %v3382_v63 }
  0x2f   :  { %3075 = vmatpush3.bf16.msra.mxu0 %v3379_v62  ;;  %3082 = vmatprep.subr.bf16.mxu1 %v3547_v61 }
  0x30   :  { %3092 = vmatprep.subr.bf16.mxu0 %v3547_v61 }
  0x31   :  { %3375 = vset.pattern.permute.xlu1 %v3546_v1  ;;  %110 = vperm.xlu0 %3373, %v86_v4  }
  0x32   :  { %115 = vperm.xlu1 %3375, %v87_v5  }
  0x35   :  { %3376 = vset.pattern.permute.xlu0 %v3545_v0 }
  0x36   :  { %3377 = vset.pattern.permute.xlu1 %v3545_v0  ;;  %145 = vperm.xlu0 %3376, %v86_v4   ;;  %v179_v4 = vunpack.c.l.s4 %v3549_v3 }
  0x37   :  { %149 = vperm.xlu1 %3377, %v87_v5   ;;  %v181_v5 = vlaneseq }
  0xa4   :  { %v138_v8 = vpop.permute.xlu1 %137  ;;  %v101_v10 = vpop.permute.xlu0 %100 }
  0xa5   :  { %v126_v11 = vmul.f32 %v2867_v6, %v101_v10  ;;  %v160_v12 = vmul.f32 %v2869_v7, %v138_v8  ;;  %v182_v10 = vshrl.u32 %v181_v5, 7 }
  0xa7   :  { %v130_v13 = vadd.f32 %v126_v11, %v94_v9 }
  0xa8   :  { %v142_v14 = vpop.permute.xlu1 %141  ;;  %v106_v15 = vpop.permute.xlu0 %105 }
  0xa9   :  { %v127_v16 = vmul.f32 %v2867_v6, %v106_v15  ;;  %v164_v17 = vadd.f32 %v160_v12, %v130_v13  ;;  %v161_v18 = vmul.f32 %v2869_v7, %v142_v14  ;;  %v2871_v15 = vld.sshfl [vmem:[%s4271_s4] sm:$0x11 pattern:$0x75316420] }
  0xab   :  { %v131_v19 = vadd.f32 %v127_v16, %v94_v9  ;;  %v218_v20 = vsel %vm217_vm0, %v164_v17, 0.0  ;;  %v180_v9 = vunpack.c.0.s8 %v179_v4  ;;  %v2888_v4 = vld [vmem:[%s4273_s6 + $0x1] ss:$0 sm:$0xff] }
  0xac   :  { %219 = vadd.xlane.f32.xlu1 %v218_v20  ;;  %v111_v22 = vpop.permute.xlu0 %110  ;;  %v3710_v20 = vsub.s32 0, %v182_v10 }
  0xad   :  { %v116_v23 = vpop.permute.xlu1 %115  ;;  %v165_v24 = vadd.f32 %v161_v18, %v131_v19  ;;  %v128_v25 = vmul.f32 %v2868_v21, %v111_v22  ;;  %v183_v12 = vsub.s32 %v180_v9, %v182_v10 }
  0xae   :  { %v129_v27 = vmul.f32 %v2868_v21, %v116_v23  ;;  %v2873_v21 = vld.sshfl [vmem:[%s4271_s4 + $0x2] sm:$0x11 pattern:$0x75316420]  ;;  %s3558_s4 = smov 32  }
  0xaf   :  { %v221_v28 = vsel %vm217_vm0, %v165_v24, 0.0  ;;  %v132_v31 = vadd.f32 %v128_v25, %v95_v26  ;;  %v184_v19 = vrot.slane %v2871_v15, %v183_v12  ;;  %v209_v23 = vrot.slane %v2873_v21, %v183_v12 }
  0xb0   :  { %222 = vadd.xlane.f32.xlu0 %v221_v28  ;;  %v133_v34 = vadd.f32 %v129_v27, %v95_v26  ;;  %v177_v26 = vcombine.high %v2871_v15, %v2871_v15  ;;  %v202_v28 = vcombine.high %v2873_v21, %v2873_v21  ;;  %v3390_v15 = vld [vmem:[%s4276_s9 + $0x8] sm:$0xff]  }
  0xb1   :  { %v146_v30 = vpop.permute.xlu0 %145  ;;  %v274_v25 = vrot.slane %v184_v19, %v3710_v20 }
  0xb2   :  { %v162_v32 = vmul.f32 %v2870_v29, %v146_v30  ;;  %v150_v33 = vpop.permute.xlu1 %149 }
  0xb3   :  { %v163_v35 = vmul.f32 %v2870_v29, %v150_v33 }
  0xb4   :  { %v166_v36 = vadd.f32 %v162_v32, %v132_v31  ;;  %v288_v31 = vrot.slane %v209_v23, %v3710_v20  ;;  %v191_v32 = vrot.slane %v177_v26, %v183_v12 }
  0xb5   :  { %v167_v37 = vadd.f32 %v163_v35, %v133_v34  ;;  %v216_v34 = vrot.slane %v202_v28, %v183_v12  ;;  %v2900_v28 = vld [vmem:[%s4275_s8 + $0x1] ss:$0 sm:$0xff] }
  0xb6   :  { %v224_v38 = vsel %vm217_vm0, %v166_v36, 0.0 }
  0xb7   :  { %225 = vadd.xlane.f32.xlu0 %v224_v38  ;;  %v227_v39 = vsel %vm217_vm0, %v167_v37, 0.0  ;;  %v278_v38 = vrot.slane %v191_v32, %v3710_v20 }
  0xb8   :  { %228 = vadd.xlane.f32.xlu1 %v227_v39 }
 0x135   :  { %v220_v40 = vpop.xlane.xlu1 %219 }
 0x136   :  { %v231_v41 = vmul.f32 0.03125, %v220_v40 }
 0x138   :  { %v3669_v42 = vsub.f32 %v164_v17, %v231_v41 }
 0x139   :  { %v223_v43 = vpop.xlane.xlu0 %222 }
 0x13a   :  { %v232_v44 = vmul.f32 0.03125, %v223_v43  ;;  %v239_v45 = vmul.f32 %v3669_v42, %v3669_v42  ;;  %v292_v43 = vrot.slane %v216_v34, %v3710_v20 }
 0x13c   :  { %v3673_v46 = vsub.f32 %v165_v24, %v232_v44  ;;  %v243_v47 = vsel %vm217_vm0, %v239_v45, 0.0  ;;  %v3381_v45 = vld [vmem:[%s4272_s5 + $0x10] sm:$0xff]  }
 0x13d   :  { %244 = vadd.xlane.f32.xlu0 %v243_v47 }
 0x13e   :  { %v240_v48 = vmul.f32 %v3673_v46, %v3673_v46 }
 0x140   :  { %v226_v49 = vpop.xlane.xlu0 %225  ;;  %v246_v50 = vsel %vm217_vm0, %v240_v48, 0.0 }
 0x141   :  { %v233_v51 = vmul.f32 0.03125, %v226_v49  ;;  %v229_v52 = vpop.xlane.xlu1 %228  ;;  %247 = vadd.xlane.f32.xlu1 %v246_v50 }
 0x142   :  { %v234_v53 = vmul.f32 0.03125, %v229_v52  ;;  %v3384_v52 = vld [vmem:[%s4274_s7 + $0x8] sm:$0xff]  }
 0x143   :  { %v3679_v54 = vsub.f32 %v166_v36, %v233_v51  ;;  %v3383_v51 = vld [vmem:[%s4274_s7 + $0x10] sm:$0xff]  }
 0x144   :  { %v3681_v55 = vsub.f32 %v167_v37, %v234_v53  ;;  %v3380_v37 = vld [vmem:[%s4272_s5 + $0x18] sm:$0xff]   ;;  %3083 = vmatpush3.bf16.msra.mxu1 %v3383_v51 }
 0x145   :  { %v241_v56 = vmul.f32 %v3679_v54, %v3679_v54  ;;  %3084 = vmatprep.subr.bf16.mxu1 %v3547_v61  ;;  %v3385_v53 = vld [vmem:[%s4274_s7 + $0x38] sm:$0xff]  }
 0x146   :  { %v242_v57 = vmul.f32 %v3681_v55, %v3681_v55 }
 0x147   :  { %v249_v58 = vsel %vm217_vm0, %v241_v56, 0.0  ;;  %v3388_v56 = vld [vmem:[%s4274_s7 + $0x28] sm:$0xff]  }
 0x148   :  { %250 = vadd.xlane.f32.xlu0 %v249_v58  ;;  %v252_v59 = vsel %vm217_vm0, %v242_v57, 0.0  ;;  %3085 = vmatpush3.bf16.msra.mxu1 %v3384_v52  ;;  %v3389_v57 = vld [vmem:[%s4274_s7 + $0x20] sm:$0xff]  }
 0x149   :  { %253 = vadd.xlane.f32.xlu1 %v252_v59  ;;  %3086 = vmatprep.subr.bf16.mxu1 %v3547_v61  ;;  %v2874_v58 = vld [vmem:[%s4273_s6] ss:$0 sm:$0xff] }
 0x1c6   :  { %v245_v0 = vpop.xlane.xlu0 %244 }
 0x1c7   :  { %v255_v1 = vmul.f32 0.03125, %v245_v0 }
 0x1c9   :  { %v259_v2 = vadd.f32 1e-05, %v255_v1 }
 0x1ca   :  { %v248_v6 = vpop.xlane.xlu1 %247 }
 0x1cb   :  { %3402 = vrsqrt.f32 %v259_v2  ;;  %v256_v7 = vmul.f32 0.03125, %v248_v6 }
 0x1cd   :  { %v260_v8 = vadd.f32 1e-05, %v256_v7 }
 0x1cf   :  { %3404 = vrsqrt.f32 %v260_v8 }
 0x1d1   :  { %v251_v11 = vpop.xlane.xlu0 %250 }
 0x1d2   :  { %v257_v13 = vmul.f32 0.03125, %v251_v11  ;;  %v254_v14 = vpop.xlane.xlu1 %253 }
 0x1d3   :  { %v258_v16 = vmul.f32 0.03125, %v254_v14 }
 0x1d4   :  { %v261_v17 = vadd.f32 1e-05, %v257_v13 }
 0x1d5   :  { %v262_v18 = vadd.f32 1e-05, %v258_v16  ;;  %v3391_v16 = vld [vmem:[%s4276_s9] sm:$0xff]  }
 0x1d6   :  { %3406 = vrsqrt.f32 %v261_v17  ;;  %v3795_v17 = vld [vmem:[#allocation7] ss:$0 sm:$0xff] }
 0x1d7   :  { %3408 = vrsqrt.f32 %v262_v18  ;;  %690 = vrot.lane.b32.xlu0 %v3795_v17, %s3550_s15  ;;  %v2878_v18 = vld [vmem:[%s4275_s8] ss:$0 sm:$0xff]  ;;  %s3551_s8 = smov 120  }
 0x1d8   :  { %v3403_v22 = vpop.eup %3402 }
 0x1d9   :  { %v267_v24 = vmul.f32 %v3403_v22, %v3669_v42 }
 0x1db   :  { %v281_v30 = vmul.f32 %v274_v25, %v267_v24 }
 0x1dc   :  { %v3405_v27 = vpop.eup %3404 }
 0x1dd   :  { %v268_v29 = vmul.f32 %v3405_v27, %v3673_v46  ;;  %v3719_v35 = vadd.f32 %v288_v31, %v281_v30  ;;  %v3392_v30 = vld [vmem:[%s4277_s10 + $0x8] sm:$0xff]  }
 0x1df   :  { %v282_v33 = vmul.f32 %v274_v25, %v268_v29 }
 0x1e1   :  { %v3721_v36 = vadd.f32 %v288_v31, %v282_v33 }
 0x1e3   :  { %v3407_v39 = vpop.eup %3406  ;;  %v299_v40 = vpack.c.bf16 %v3721_v36, %v3719_v35 }
 0x1e4   :  { %v3409_v41 = vpop.eup %3408  ;;  %v269_v42 = vmul.f32 %v3407_v39, %v3679_v54  ;;  %v3386_v54 = vld [vmem:[%s4274_s7] sm:$0xff]  }
 0x1e5   :  { %v270_v44 = vmul.f32 %v3409_v41, %v3681_v55  ;;  %3077 = vmatmul.mubr.msk.bf16.vlgmr.msra.gmra.mxu0 %vm217_vm0, %v299_v40  ;;  %v3387_v55 = vld [vmem:[%s4274_s7 + $0x30] sm:$0xff]   ;;  %3087 = vmatpush3.bf16.msra.mxu1 %v3386_v54  ;;  %s3557_s7 = smov 24  }
 0x1e6   :  { %3093 = vmatpush3.bf16.msra.mxu0 %v3380_v37  ;;  %3096 = vmatprep.mubr.msk.bf16.mxu0 %vm3548_vm1, %v3547_v61  ;;  %v283_v46 = vmul.f32 %v278_v38, %v269_v42 }
 0x1e7   :  { %3094 = vmatprep.subr.bf16.mxu0 %v3547_v61  ;;  %v284_v47 = vmul.f32 %v278_v38, %v270_v44  ;;  %3112 = vmatprep.subr.bf16.mxu1 %v3547_v61 }
 0x1e8   :  { %v3739_v48 = vadd.f32 %v292_v43, %v283_v46 }
 0x1e9   :  { %v3741_v49 = vadd.f32 %v292_v43, %v284_v47 }
 0x1ea   :  { %3095 = vmatpush3.bf16.msra.mxu0 %v3381_v45 }
 0x1eb   :  { %v452_v50 = vpack.c.bf16 %v3741_v49, %v3739_v48  ;;  %3100 = vmatprep.subr.bf16.mxu0 %v3547_v61 }
 0x1ed   :  { %3097 = vmatmul.mubr.msk.bf16.vlgmr.msra.gmra.mxu0 %vm217_vm0, %v452_v50 }
 0x1ee   :  { %3108 = vmatprep.mubr.msk.bf16.mxu0 %vm3548_vm1, %v3547_v61  ;;  %3101 = vmatpush3.bf16.msra.mxu0 %v3385_v53 }
 0x1ef   :  { %3102 = vmatprep.subr.bf16.mxu0 %v3547_v61 }
 0x1f2   :  { %3103 = vmatpush3.bf16.msra.mxu0 %v3387_v55 }
 0x1f3   :  { %3104 = vmatprep.subr.bf16.mxu0 %v3547_v61 }
 0x1f6   :  { %3105 = vmatpush3.bf16.msra.mxu0 %v3388_v56 }
 0x1f7   :  { %3106 = vmatprep.subr.bf16.mxu0 %v3547_v61 }
 0x1fa   :  { %3107 = vmatpush3.bf16.msra.mxu0 %v3389_v57 }
 0x1fb   :  { %3128 = vmatprep.subr.bf16.mxu0 %v3547_v61 }
 0x249   :  { %v691_v45 = vpop.permute.xlu0 %690 }
 0x2a5   :  { %v358_v59 = vpop.f32.mrf.mxu0 }
 0x2a6   :  { %v359_v62 = vadd.f32 %v2874_v58, %v358_v59 }
 0x2a7   :  { %v3078_v60 = vpop.f32.mrf.mxu0 }
 0x2a8   :  { %v365_v2 = vmax.f32 %v359_v62, 0.0 }
 0x2a9   :  { %v361_v63 = vpop.f32.mrf.mxu0 }
 0x2aa   :  { %v362_v0 = vadd.f32 %v2874_v58, %v361_v63  ;;  %v88_v63 = vld [vmem:[#allocation3] sm:$0x1] }
 0x2ab   :  { %v3079_v1 = vpop.f32.mrf.mxu0 }
 0x2ac   :  { %v366_v3 = vmax.f32 %v362_v0, 0.0  ;;  %v90_v0 = vsub.f32 1.0, %v88_v63  ;;  %v89_v1 = vld [vmem:[#allocation3 + $0x1] sm:$0x1] }
 0x2ad   :  { %v512_v5 = vpop.f32.mrf.mxu0 }
 0x2ae   :  { %v367_v6 = vpack.c.bf16 %v366_v3, %v365_v2  ;;  %v513_v8 = vadd.f32 %v2888_v4, %v512_v5  ;;  %v92_v2 = vmul.f32 -1e+09, %v90_v0  ;;  %v91_v3 = vsub.f32 1.0, %v89_v1 }
 0x2af   :  { %v3098_v7 = vpop.f32.mrf.mxu0 }
 0x2b0   :  { %3089 = vmatmul.mubr.msk.bf16.vlgmr.msra.gmra.mxu1 %vm405_vm2, %v367_v6  ;;  %v519_v12 = vmax.f32 %v513_v8, 0.0  ;;  %v93_v5 = vmul.f32 -1e+09, %v91_v3 }
 0x2b1   :  { %v515_v9 = vpop.f32.mrf.mxu0  ;;  %3116 = vmatprep.mubr.msk.bf16.mxu1 %vm3548_vm1, %v3547_v61  ;;  %3113 = vmatpush3.bf16.msra.mxu1 %v3390_v15 }
 0x2b2   :  { %v516_v10 = vadd.f32 %v2888_v4, %v515_v9  ;;  %3114 = vmatprep.subr.bf16.mxu1 %v3547_v61  ;;  %v3873_v4 = vrot.slane %v92_v2, %v3710_v20  ;;  %v3877_v8 = vrot.slane %v93_v5, %v3710_v20 }
 0x2b3   :  { %v3099_v11 = vpop.f32.mrf.mxu0 }
 0x2b4   :  { %v520_v13 = vmax.f32 %v516_v10, 0.0 }
 0x2b5   :  { %3115 = vmatpush3.bf16.msra.mxu1 %v3391_v16 }
 0x2b6   :  { %v521_v14 = vpack.c.bf16 %v520_v13, %v519_v12  ;;  %3120 = vmatprep.subr.bf16.mxu1 %v3547_v61 }
 0x2b8   :  { %3109 = vmatmul.mubr.msk.bf16.vlgmr.msra.gmra.mxu0 %vm405_vm2, %v521_v14 }
 0x2b9   :  { %3130 = vmatprep.mubr.msk.bf16.mxu0 %vm3548_vm1, %v3547_v61 }
 0x370   :  { %v443_v19 = vpop.f32.mrf.mxu1 }
 0x371   :  { %v444_v22 = vadd.f32 %v2878_v18, %v443_v19 }
 0x372   :  { %v3090_v21 = vpop.f32.mrf.mxu1 }
 0x373   :  { %v3803_v26 = vadd.f32 %v444_v22, %v3719_v35  ;;  %v3393_v35 = vld [vmem:[%s4277_s10] sm:$0xff]  }
 0x374   :  { %v446_v23 = vpop.f32.mrf.mxu1 }
 0x375   :  { %v447_v24 = vadd.f32 %v2878_v18, %v446_v23 }
 0x376   :  { %v3091_v25 = vpop.f32.mrf.mxu1 }
 0x377   :  { %v3806_v27 = vadd.f32 %v447_v24, %v3721_v36 }
 0x378   :  { %v597_v29 = vpop.f32.mrf.mxu0 }
 0x379   :  { %v606_v31 = vpack.c.bf16 %v3806_v27, %v3803_v26  ;;  %v598_v33 = vadd.f32 %v2900_v28, %v597_v29 }
 0x37a   :  { %v3110_v32 = vpop.f32.mrf.mxu0 }
 0x37b   :  { %3117 = vmatmul.mubr.msk.bf16.vlgmr.msra.gmra.mxu1 %vm217_vm0, %v606_v31  ;;  %v3824_v38 = vadd.f32 %v598_v33, %v3739_v48 }
 0x37c   :  { %v600_v34 = vpop.f32.mrf.mxu0  ;;  %3121 = vmatpush3.bf16.msra.mxu1 %v3392_v30  ;;  %3124 = vmatprep.mubr.msk.bf16.mxu1 %vm3548_vm1, %v3547_v61 }
 0x37d   :  { %v601_v36 = vadd.f32 %v2900_v28, %v600_v34  ;;  %3122 = vmatprep.subr.bf16.mxu1 %v3547_v61 }
 0x37e   :  { %v3111_v37 = vpop.f32.mrf.mxu0 }
 0x37f   :  { %v3827_v39 = vadd.f32 %v601_v36, %v3741_v49 }
 0x380   :  { %3123 = vmatpush3.bf16.msra.mxu1 %v3393_v35 }
 0x381   :  { %v3831_v40 = vpack.c.bf16 %v3827_v39, %v3824_v38  ;;  %3134 = vmatprep.subr.bf16.mxu1 %v3547_v61 }
 0x383   :  { %3125 = vmatmul.mubr.msk.bf16.vlgmr.msra.gmra.mxu1 %vm217_vm0, %v3831_v40 }
 0x384   :  { %3136 = vmatprep.mubr.msk.bf16.mxu1 %vm3548_vm1, %v3547_v61 }
 0x43b   :  { %v665_v41 = vpop.f32.mrf.mxu1 }
 0x43c   :  { %v666_v54 = vadd.f32 %v3795_v17, %v665_v41 }
 0x43d   :  { %v3118_v42 = vpop.f32.mrf.mxu1 }
 0x43e   :  { %v3850_v57 = vpack.c.bf16 %v666_v54, %v666_v54 }
 0x43f   :  { %v668_v43 = vpop.f32.mrf.mxu1 }
 0x440   :  { %v669_v58 = vadd.f32 %v3795_v17, %v668_v43 }
 0x441   :  { %v3119_v44 = vpop.f32.mrf.mxu1 }
 0x442   :  { %v3860_v59 = vpack.c.bf16 %v669_v58, %v669_v58 }
 0x443   :  { %v730_v46 = vpop.f32.mrf.mxu1 }
 0x444   :  { %v731_v47 = vadd.f32 %v730_v46, %v691_v45 }
 0x445   :  { %v3126_v48 = vpop.f32.mrf.mxu1 }
 0x446   :  { %v3838_v49 = vpack.c.bf16 %v731_v47, %v731_v47 }
 0x447   :  { %v733_v50 = vpop.f32.mrf.mxu1 }
 0x448   :  { %v734_v51 = vadd.f32 %v733_v50, %v691_v45  ;;  %v758_v52 = vsel %vm753_vm3, %v3838_v49, 0 }
 0x449   :  { %v3127_v53 = vpop.f32.mrf.mxu1  ;;  %3129 = vmatpush3.bf16.xpose.msra.mxu0 %v758_v52 }
 0x44a   :  { %v3843_v55 = vpack.c.bf16 %v734_v51, %v734_v51  ;;  %3140 = vmatprep.subr.bf16.mxu0 %v3547_v61 }
 0x44c   :  { %921 = vrot.lane.b32.xlu0 %v3843_v55, %s3550_s15  ;;  %v804_v56 = vsel %vm753_vm3, %v3843_v55, 0 }
 0x44d   :  { %3135 = vmatpush3.bf16.xpose.msra.mxu1 %v804_v56 }
 0x44e   :  { %3146 = vmatprep.subr.bf16.mxu1 %v3547_v61 }
 0x450   :  { %974 = vrot.lane.b32.xlu0 %v3838_v49, %s3551_s8  ;;  %3131 = vmatmul.mubr.msk.bf16.vlgmr.msra.gmra.mxu0 %vm753_vm3, %v3850_v57 }
 0x451   :  { %3142 = vmatprep.mubr.msk.bf16.mxu0 %vm3548_vm1, %v3547_v61 }
 0x454   :  { %3137 = vmatmul.mubr.msk.bf16.vlgmr.msra.gmra.mxu1 %vm753_vm3, %v3860_v59  ;;  %1025 = vrot.lane.b32.xlu0 %v3843_v55, %s3551_s8 }
 0x455   :  { %3148 = vmatprep.mubr.msk.bf16.mxu1 %vm3548_vm1, %v3547_v61 }
 0x458   :  { %972 = vrot.lane.b32.xlu0 %v3850_v57, %s3551_s8 }
 0x4be   :  { %v922_v60 = vpop.permute.xlu0 %921 }
 0x4bf   :  { %v927_v62 = vsel %vm876_vm4, %v922_v60, 0 }
 0x4c0   :  { %3147 = vmatpush3.bf16.msra.mxu1 %v927_v62 }
 0x4c1   :  { %3158 = vmatprep.subr.bf16.mxu1 %v3547_v61 }
 0x4c2   :  { %v975_v37 = vpop.permute.xlu0 %974 }
 0x4c3   :  { %v980_v44 = vsel %vm753_vm3, %v975_v37, 0 }
 0x4c6   :  { %v1026_v46 = vpop.permute.xlu0 %1025 }
 0x4c7   :  { %v1031_v48 = vsel %vm753_vm3, %v1026_v46, 0 }
 0x4ca   :  { %v973_v50 = vpop.permute.xlu0 %972 }
 0x510   :  { %v794_v6 = vpop.f32.mrf.mxu0 }
 0x511   :  { %v795_v7 = vadd.f32 %v794_v6, %v3873_v4 }
 0x512   :  { %v3132_v9 = vpop.f32.mrf.mxu0 }
 0x513   :  { %v846_v10 = vsel %vm753_vm3, %v795_v7, -inf }
 0x514   :  { %v840_v11 = vpop.f32.mrf.mxu1  ;;  %847 = vmax.xlane.f32.xlu1 %v846_v10  ;;  %v797_v12 = vpop.f32.mrf.mxu0 }
 0x515   :  { %v841_v13 = vadd.f32 %v840_v11, %v3877_v8 }
 0x516   :  { %v3133_v14 = vpop.f32.mrf.mxu0  ;;  %v3138_v15 = vpop.f32.mrf.mxu1 }
 0x517   :  { %v849_v16 = vsel %vm753_vm3, %v841_v13, -inf }
 0x518   :  { %v843_v18 = vpop.f32.mrf.mxu1  ;;  %850 = vmax.xlane.f32.xlu1 %v849_v16 }
 0x51a   :  { %v3139_v19 = vpop.f32.mrf.mxu1 }
 0x59d   :  { %v848_v21 = vpop.xlane.xlu1 %847 }
 0x59e   :  { %v852_v22 = vsub.f32 %v795_v7, %v848_v21 }
 0x5a0   :  { %v854_v23 = vmul.f32 1.442695, %v852_v22 }
 0x5a1   :  { %v851_v20 = vpop.xlane.xlu1 %850 }
 0x5a2   :  { %3410 = vpow2.f32 %v854_v23  ;;  %v853_v24 = vsub.f32 %v841_v13, %v851_v20 }
 0x5a4   :  { %v856_v25 = vmul.f32 1.442695, %v853_v24 }
 0x5a6   :  { %3412 = vpow2.f32 %v856_v25 }
 0x5af   :  { %v3411_v28 = vpop.eup %3410 }
 0x5b0   :  { %v858_v29 = vsel %vm753_vm3, %v3411_v28, 0.0 }
 0x5b1   :  { %859 = vadd.xlane.f32.xlu1 %v858_v29 }
 0x5b3   :  { %v3413_v30 = vpop.eup %3412 }
 0x5b4   :  { %v861_v31 = vsel %vm753_vm3, %v3413_v30, 0.0 }
 0x5b5   :  { %862 = vadd.xlane.f32.xlu1 %v861_v31 }
 0x5c6   :  { %871 = vrot.lane.b32.xlu1 %v3838_v49, %s3550_s15 }
 0x5ca   :  { %1023 = vrot.lane.b32.xlu1 %v3860_v59, %s3551_s8 }
 0x63a   :  { %v860_v32 = vpop.xlane.xlu1 %859 }
 0x63b   :  { %3414 = vrcp.f32 %v860_v32 }
 0x63e   :  { %v863_v33 = vpop.xlane.xlu1 %862 }
 0x63f   :  { %3416 = vrcp.f32 %v863_v33 }
 0x642   :  { %v872_v34 = vpop.permute.xlu1 %871 }
 0x643   :  { %v878_v35 = vsel %vm876_vm4, %v872_v34, 0 }
 0x644   :  { %3141 = vmatpush3.bf16.msra.mxu0 %v878_v35 }
 0x645   :  { %3152 = vmatprep.subr.bf16.mxu0 %v3547_v61 }
 0x646   :  { %v1024_v51 = vpop.permute.xlu1 %1023 }
 0x648   :  { %v3415_v36 = vpop.eup %3414 }
 0x649   :  { %v866_v41 = vmul.f32 %v3415_v36, %v3411_v28 }
 0x64b   :  { %v868_v42 = vpack.c.bf16 %v866_v41, %v866_v41 }
 0x64c   :  { %v3417_v43 = vpop.eup %3416 }
 0x64d   :  { %3143 = vmatmul.mubr.msk.bf16.vlgmr.msra.gmra.mxu0 %vm753_vm3, %v868_v42  ;;  %v867_v45 = vmul.f32 %v3417_v43, %v3413_v30 }
 0x64e   :  { %3153 = vmatpush3.bf16.xpose.msra.mxu0 %v980_v44  ;;  %3154 = vmatprep.mubr.msk.bf16.mxu0 %vm3548_vm1, %v3547_v61 }
 0x64f   :  { %v869_v47 = vpack.c.bf16 %v867_v45, %v867_v45  ;;  %3164 = vmatprep.subr.bf16.mxu0 %v3547_v61 }
 0x651   :  { %3149 = vmatmul.mubr.msk.bf16.vlgmr.msra.gmra.mxu1 %vm753_vm3, %v869_v47 }
 0x652   :  { %3159 = vmatpush3.bf16.xpose.msra.mxu1 %v1031_v48  ;;  %3160 = vmatprep.mubr.msk.bf16.mxu1 %vm3548_vm1, %v3547_v61 }
 0x653   :  { %3170 = vmatprep.subr.bf16.mxu1 %v3547_v61 }
 0x655   :  { %3155 = vmatmul.mubr.msk.bf16.vlgmr.msra.gmra.mxu0 %vm753_vm3, %v973_v50 }
 0x656   :  { %3166 = vmatprep.mubr.msk.bf16.mxu0 %vm3548_vm1, %v3547_v61 }
 0x659   :  { %3161 = vmatmul.mubr.msk.bf16.vlgmr.msra.gmra.mxu1 %vm753_vm3, %v1024_v51 }
 0x65a   :  { %3172 = vmatprep.mubr.msk.bf16.mxu1 %vm3548_vm1, %v3547_v61 }
 0x70d   :  { %v914_v52 = vpop.f32.mrf.mxu0 }
 0x70e   :  { %969 = vst.msk [vmem:[#allocation2] sm:$0xff] %vm753_vm3, %v914_v52 }
 0x70f   :  { %v3144_v53 = vpop.f32.mrf.mxu0 }
 0x711   :  { %v917_v54 = vpop.f32.mrf.mxu0  ;;  %v963_v56 = vpop.f32.mrf.mxu1 }
 0x712   :  { %970 = vst.msk [vmem:[#allocation2 + $0x8] sm:$0xff] %vm753_vm3, %v963_v56 }
 0x713   :  { %v3145_v58 = vpop.f32.mrf.mxu0  ;;  %v3150_v60 = vpop.f32.mrf.mxu1 }
 0x715   :  { %v966_v62 = vpop.f32.mrf.mxu1  ;;  %v1016_v63 = vpop.f32.mrf.mxu0 }
 0x716   :  { %v1017_v0 = vadd.f32 %v1016_v63, %v3873_v4 }
 0x717   :  { %v3151_v1 = vpop.f32.mrf.mxu1  ;;  %v3156_v2 = vpop.f32.mrf.mxu0 }
 0x718   :  { %v1073_v3 = vsel %vm753_vm3, %v1017_v0, -inf }
 0x719   :  { %v1067_v5 = vpop.f32.mrf.mxu1  ;;  %1074 = vmax.xlane.f32.xlu0 %v1073_v3  ;;  %v1019_v6 = vpop.f32.mrf.mxu0 }
 0x71a   :  { %v1068_v7 = vadd.f32 %v1067_v5, %v3877_v8 }
 0x71b   :  { %v3157_v9 = vpop.f32.mrf.mxu0  ;;  %v3162_v10 = vpop.f32.mrf.mxu1 }
 0x71c   :  { %v1076_v11 = vsel %vm753_vm3, %v1068_v7, -inf }
 0x71d   :  { %1077 = vmax.xlane.f32.xlu1 %v1076_v11  ;;  %v1070_v12 = vpop.f32.mrf.mxu1 }
 0x71f   :  { %v3163_v13 = vpop.f32.mrf.mxu1 }
 0x72e   :  { %1097 = vrot.lane.b32.xlu1 %v3838_v49, %s3552_s3 }
 0x732   :  { %1206 = vrot.lane.b32.xlu1 %v3838_v49, %s3553_s2 }
 0x736   :  { %1256 = vrot.lane.b32.xlu1 %v3843_v55, %s3553_s2 }
 0x73a   :  { %1254 = vrot.lane.b32.xlu1 %v3860_v59, %s3553_s2 }
 0x7a2   :  { %v1075_v14 = vpop.xlane.xlu0 %1074 }
 0x7a3   :  { %v1079_v15 = vsub.f32 %v1017_v0, %v1075_v14 }
 0x7a5   :  { %v1081_v16 = vmul.f32 1.442695, %v1079_v15 }
 0x7a6   :  { %v1078_v18 = vpop.xlane.xlu1 %1077 }
 0x7a7   :  { %3418 = vpow2.f32 %v1081_v16  ;;  %v1080_v19 = vsub.f32 %v1068_v7, %v1078_v18 }
 0x7a9   :  { %v1083_v21 = vmul.f32 1.442695, %v1080_v19 }
 0x7aa   :  { %v1098_v22 = vpop.permute.xlu1 %1097 }
 0x7ab   :  { %3420 = vpow2.f32 %v1083_v21  ;;  %v1103_v23 = vsel %vm876_vm4, %v1098_v22, 0 }
 0x7ac   :  { %3165 = vmatpush3.bf16.msra.mxu0 %v1103_v23 }
 0x7ad   :  { %3176 = vmatprep.subr.bf16.mxu0 %v3547_v61 }
 0x7ae   :  { %v1207_v34 = vpop.permute.xlu1 %1206 }
 0x7af   :  { %v1212_v41 = vsel %vm753_vm3, %v1207_v34, 0 }
 0x7b2   :  { %v1257_v43 = vpop.permute.xlu1 %1256 }
 0x7b3   :  { %v1262_v45 = vsel %vm753_vm3, %v1257_v43, 0 }
 0x7b4   :  { %v3419_v20 = vpop.eup %3418 }
 0x7b5   :  { %v1085_v24 = vsel %vm753_vm3, %v3419_v20, 0.0 }
 0x7b6   :  { %1086 = vadd.xlane.f32.xlu0 %v1085_v24  ;;  %v1255_v47 = vpop.permute.xlu1 %1254 }
 0x7b8   :  { %v3421_v25 = vpop.eup %3420 }
 0x7b9   :  { %v1088_v28 = vsel %vm753_vm3, %v3421_v25, 0.0 }
 0x7ba   :  { %1089 = vadd.xlane.f32.xlu0 %v1088_v28 }
 0x7d0   :  { %1145 = vrot.lane.b32.xlu0 %v3843_v55, %s3552_s3 }
 0x7d4   :  { %1204 = vrot.lane.b32.xlu0 %v3850_v57, %s3553_s2 }
 0x83f   :  { %v1087_v29 = vpop.xlane.xlu0 %1086 }
 0x840   :  { %3422 = vrcp.f32 %v1087_v29 }
 0x843   :  { %v1090_v30 = vpop.xlane.xlu0 %1089 }
 0x844   :  { %3424 = vrcp.f32 %v1090_v30 }
 0x847   :  { %v1146_v31 = vpop.permute.xlu0 %1145 }
 0x848   :  { %v1151_v32 = vsel %vm876_vm4, %v1146_v31, 0 }
 0x849   :  { %3171 = vmatpush3.bf16.msra.mxu1 %v1151_v32 }
 0x84a   :  { %3182 = vmatprep.subr.bf16.mxu1 %v3547_v61 }
 0x84b   :  { %v1205_v46 = vpop.permute.xlu0 %1204 }
 0x84d   :  { %v3423_v33 = vpop.eup %3422 }
 0x84e   :  { %v1093_v35 = vmul.f32 %v3423_v33, %v3419_v20 }
 0x850   :  { %v1095_v36 = vpack.c.bf16 %v1093_v35, %v1093_v35 }
 0x851   :  { %v3425_v37 = vpop.eup %3424 }
 0x852   :  { %3167 = vmatmul.mubr.msk.bf16.vlgmr.msra.gmra.mxu0 %vm753_vm3, %v1095_v36  ;;  %v1094_v42 = vmul.f32 %v3425_v37, %v3421_v25 }
 0x853   :  { %3177 = vmatpush3.bf16.xpose.msra.mxu0 %v1212_v41  ;;  %3178 = vmatprep.mubr.msk.bf16.mxu0 %vm3548_vm1, %v3547_v61 }
 0x854   :  { %v1096_v44 = vpack.c.bf16 %v1094_v42, %v1094_v42  ;;  %3188 = vmatprep.subr.bf16.mxu0 %v3547_v61 }
 0x856   :  { %3173 = vmatmul.mubr.msk.bf16.vlgmr.msra.gmra.mxu1 %vm753_vm3, %v1096_v44 }
 0x857   :  { %3183 = vmatpush3.bf16.xpose.msra.mxu1 %v1262_v45  ;;  %3184 = vmatprep.mubr.msk.bf16.mxu1 %vm3548_vm1, %v3547_v61 }
 0x858   :  { %3194 = vmatprep.subr.bf16.mxu1 %v3547_v61 }
 0x85a   :  { %3179 = vmatmul.mubr.msk.bf16.vlgmr.msra.gmra.mxu0 %vm753_vm3, %v1205_v46 }
 0x85b   :  { %3190 = vmatprep.mubr.msk.bf16.mxu0 %vm3548_vm1, %v3547_v61 }
 0x85e   :  { %3185 = vmatmul.mubr.msk.bf16.vlgmr.msra.gmra.mxu1 %vm753_vm3, %v1255_v47 }
 0x85f   :  { %3196 = vmatprep.mubr.msk.bf16.mxu1 %vm3548_vm1, %v3547_v61 }
 0x912   :  { %v3946_v48 = vpop.f32.mrf.mxu0 }
 0x914   :  { %v3168_v50 = vpop.f32.mrf.mxu0 }
 0x916   :  { %v1142_v51 = vpop.f32.mrf.mxu0  ;;  %v3948_v52 = vpop.f32.mrf.mxu1 }
 0x918   :  { %v3169_v53 = vpop.f32.mrf.mxu0  ;;  %v3174_v54 = vpop.f32.mrf.mxu1 }
 0x91a   :  { %v1190_v56 = vpop.f32.mrf.mxu1  ;;  %v1248_v58 = vpop.f32.mrf.mxu0 }
 0x91b   :  { %v1249_v60 = vadd.f32 %v1248_v58, %v3873_v4 }
 0x91c   :  { %v3175_v62 = vpop.f32.mrf.mxu1  ;;  %v3180_v63 = vpop.f32.mrf.mxu0 }
 0x91d   :  { %v1304_v0 = vsel %vm753_vm3, %v1249_v60, -inf }
 0x91e   :  { %v1298_v1 = vpop.f32.mrf.mxu1  ;;  %1305 = vmax.xlane.f32.xlu0 %v1304_v0  ;;  %v1251_v2 = vpop.f32.mrf.mxu0 }
 0x91f   :  { %v1299_v3 = vadd.f32 %v1298_v1, %v3877_v8 }
 0x920   :  { %v3181_v5 = vpop.f32.mrf.mxu0  ;;  %v3186_v6 = vpop.f32.mrf.mxu1 }
 0x921   :  { %v1307_v7 = vsel %vm753_vm3, %v1299_v3, -inf }
 0x922   :  { %1308 = vmax.xlane.f32.xlu1 %v1307_v7  ;;  %v1301_v9 = vpop.f32.mrf.mxu1 }
 0x924   :  { %v3187_v10 = vpop.f32.mrf.mxu1 }
 0x933   :  { %1328 = vrot.lane.b32.xlu1 %v3838_v49, %s3554_s23 }
 0x937   :  { %1437 = vrot.lane.b32.xlu1 %v3838_v49, %s3555_s24 }
 0x93b   :  { %1487 = vrot.lane.b32.xlu1 %v3843_v55, %s3555_s24 }
 0x93f   :  { %1485 = vrot.lane.b32.xlu1 %v3860_v59, %s3555_s24 }
 0x9a7   :  { %v1306_v11 = vpop.xlane.xlu0 %1305 }
 0x9a8   :  { %v1310_v12 = vsub.f32 %v1249_v60, %v1306_v11 }
 0x9aa   :  { %v1312_v13 = vmul.f32 1.442695, %v1310_v12 }
 0x9ab   :  { %v1309_v14 = vpop.xlane.xlu1 %1308 }
 0x9ac   :  { %3426 = vpow2.f32 %v1312_v13  ;;  %v1311_v15 = vsub.f32 %v1299_v3, %v1309_v14 }
 0x9ae   :  { %v1314_v16 = vmul.f32 1.442695, %v1311_v15 }
 0x9af   :  { %v1329_v18 = vpop.permute.xlu1 %1328 }
 0x9b0   :  { %3428 = vpow2.f32 %v1314_v16  ;;  %v1334_v19 = vsel %vm876_vm4, %v1329_v18, 0 }
 0x9b1   :  { %3189 = vmatpush3.bf16.msra.mxu0 %v1334_v19 }
 0x9b2   :  { %3200 = vmatprep.subr.bf16.mxu0 %v3547_v61 }
 0x9b3   :  { %v1438_v30 = vpop.permute.xlu1 %1437 }
 0x9b4   :  { %v1443_v34 = vsel %vm753_vm3, %v1438_v30, 0 }
 0x9b7   :  { %v1488_v35 = vpop.permute.xlu1 %1487 }
 0x9b8   :  { %v1493_v37 = vsel %vm753_vm3, %v1488_v35, 0 }
 0x9b9   :  { %v3427_v21 = vpop.eup %3426 }
 0x9ba   :  { %v1316_v22 = vsel %vm753_vm3, %v3427_v21, 0.0 }
 0x9bb   :  { %1317 = vadd.xlane.f32.xlu0 %v1316_v22  ;;  %v1486_v42 = vpop.permute.xlu1 %1485 }
 0x9bd   :  { %v3429_v23 = vpop.eup %3428 }
 0x9be   :  { %v1319_v59 = vsel %vm753_vm3, %v3429_v23, 0.0 }
 0x9bf   :  { %1320 = vadd.xlane.f32.xlu0 %v1319_v59 }
 0x9d5   :  { %1376 = vrot.lane.b32.xlu0 %v3843_v55, %s3554_s23 }
 0x9d9   :  { %1435 = vrot.lane.b32.xlu0 %v3850_v57, %s3555_s24 }
 0xa44   :  { %v1318_v20 = vpop.xlane.xlu0 %1317 }
 0xa45   :  { %3430 = vrcp.f32 %v1318_v20 }
 0xa48   :  { %v1321_v24 = vpop.xlane.xlu0 %1320 }
 0xa49   :  { %3432 = vrcp.f32 %v1321_v24 }
 0xa4c   :  { %v1377_v25 = vpop.permute.xlu0 %1376 }
 0xa4d   :  { %v1382_v28 = vsel %vm876_vm4, %v1377_v25, 0 }
 0xa4e   :  { %3195 = vmatpush3.bf16.msra.mxu1 %v1382_v28 }
 0xa4f   :  { %3206 = vmatprep.subr.bf16.mxu1 %v3547_v61 }
 0xa50   :  { %v1436_v41 = vpop.permute.xlu0 %1435 }
 0xa52   :  { %v3431_v29 = vpop.eup %3430 }
 0xa53   :  { %v1324_v31 = vmul.f32 %v3431_v29, %v3427_v21 }
 0xa55   :  { %v1326_v32 = vpack.c.bf16 %v1324_v31, %v1324_v31  ;;  %v3394_v31 = vld [vmem:[%s4276_s9 + $0x18] sm:$0xff]  }
 0xa56   :  { %v3433_v33 = vpop.eup %3432 }
 0xa57   :  { %3191 = vmatmul.mubr.msk.bf16.vlgmr.msra.gmra.mxu0 %vm753_vm3, %v1326_v32  ;;  %v1325_v57 = vmul.f32 %v3433_v33, %v3429_v23  ;;  %v3395_v33 = vld [vmem:[%s4276_s9 + $0x10] sm:$0xff]  }
 0xa58   :  { %3201 = vmatpush3.bf16.xpose.msra.mxu0 %v1443_v34  ;;  %3202 = vmatprep.mubr.msk.bf16.mxu0 %vm3548_vm1, %v3547_v61  ;;  %v3396_v34 = vld [vmem:[%s4278_s11 + $0x8] sm:$0xff]  }
 0xa59   :  { %v1327_v36 = vpack.c.bf16 %v1325_v57, %v1325_v57  ;;  %3212 = vmatprep.subr.bf16.mxu0 %v3547_v61  ;;  %v3397_v57 = vld [vmem:[%s4278_s11] sm:$0xff]  }
 0xa5b   :  { %3197 = vmatmul.mubr.msk.bf16.vlgmr.msra.gmra.mxu1 %vm753_vm3, %v1327_v36 }
 0xa5c   :  { %3207 = vmatpush3.bf16.xpose.msra.mxu1 %v1493_v37  ;;  %3208 = vmatprep.mubr.msk.bf16.mxu1 %vm3548_vm1, %v3547_v61 }
 0xa5d   :  { %3218 = vmatprep.subr.bf16.mxu1 %v3547_v61 }
 0xa5f   :  { %3203 = vmatmul.mubr.msk.bf16.vlgmr.msra.gmra.mxu0 %vm753_vm3, %v1436_v41 }
 0xa60   :  { %3214 = vmatprep.mubr.msk.bf16.mxu0 %vm3548_vm1, %v3547_v61 }
 0xa63   :  { %3209 = vmatmul.mubr.msk.bf16.vlgmr.msra.gmra.mxu1 %vm753_vm3, %v1486_v42 }
 0xa64   :  { %3220 = vmatprep.mubr.msk.bf16.mxu1 %vm3548_vm1, %v3547_v61 }
 0xb17   :  { %v1370_v43 = vpop.f32.mrf.mxu0 }
 0xb19   :  { %v3192_v44 = vpop.f32.mrf.mxu0 }
 0xb1a   :  { %v4042_v44 = vld [vmem:[#allocation7 + $0x1] ss:$0 sm:$0xff] }
 0xb1b   :  { %v1373_v45 = vpop.f32.mrf.mxu0  ;;  %v1418_v46 = vpop.f32.mrf.mxu1 }
 0xb1d   :  { %v3193_v47 = vpop.f32.mrf.mxu0  ;;  %v3198_v50 = vpop.f32.mrf.mxu1 }
 0xb1f   :  { %v1421_v51 = vpop.f32.mrf.mxu1  ;;  %v1479_v53 = vpop.f32.mrf.mxu0 }
 0xb20   :  { %v1480_v54 = vadd.f32 %v1479_v53, %v3873_v4 }
 0xb21   :  { %v3199_v56 = vpop.f32.mrf.mxu1  ;;  %v3204_v58 = vpop.f32.mrf.mxu0 }
 0xb22   :  { %v1535_v60 = vsel %vm753_vm3, %v1480_v54, -inf }
 0xb23   :  { %v1529_v62 = vpop.f32.mrf.mxu1  ;;  %1536 = vmax.xlane.f32.xlu0 %v1535_v60  ;;  %v1482_v63 = vpop.f32.mrf.mxu0  ;;  %v3398_v60 = vld [vmem:[%s4277_s10 + $0x18] sm:$0xff]  }
 0xb24   :  { %v1530_v0 = vadd.f32 %v1529_v62, %v3877_v8  ;;  %v3399_v62 = vld [vmem:[%s4277_s10 + $0x10] sm:$0xff]  }
 0xb25   :  { %v3205_v1 = vpop.f32.mrf.mxu0  ;;  %v3210_v2 = vpop.f32.mrf.mxu1 }
 0xb26   :  { %v1538_v3 = vsel %vm753_vm3, %v1530_v0, -inf }
 0xb27   :  { %1539 = vmax.xlane.f32.xlu1 %v1538_v3  ;;  %v1532_v5 = vpop.f32.mrf.mxu1 }
 0xb29   :  { %v3211_v6 = vpop.f32.mrf.mxu1 }
 0xb38   :  { %1559 = vrot.lane.b32.xlu1 %v3838_v49, %s3556_s25 }
 0xb3c   :  { %1195 = vrot.lane.b32.xlu1 %v3946_v48, %s3540_s29 }
 0xb40   :  { %1197 = vrot.lane.b32.xlu1 %v3948_v52, %s3540_s29 }
 0xb44   :  { %1428 = vrot.lane.b32.xlu1 %v1418_v46, %s3542_s18 }
 0xbac   :  { %v1537_v7 = vpop.xlane.xlu0 %1536 }
 0xbad   :  { %v1541_v9 = vsub.f32 %v1480_v54, %v1537_v7 }
 0xbaf   :  { %v1543_v10 = vmul.f32 1.442695, %v1541_v9 }
 0xbb0   :  { %v1540_v11 = vpop.xlane.xlu1 %1539 }
 0xbb1   :  { %3434 = vpow2.f32 %v1543_v10  ;;  %v1542_v12 = vsub.f32 %v1530_v0, %v1540_v11 }
 0xbb3   :  { %v1545_v13 = vmul.f32 1.442695, %v1542_v12 }
 0xbb4   :  { %v1560_v14 = vpop.permute.xlu1 %1559 }
 0xbb5   :  { %3436 = vpow2.f32 %v1545_v13  ;;  %v1565_v15 = vsel %vm876_vm4, %v1560_v14, 0 }
 0xbb6   :  { %3213 = vmatpush3.bf16.msra.mxu0 %v1565_v15 }
 0xbb7   :  { %3224 = vmatprep.subr.bf16.mxu0 %v3547_v61 }
 0xbb8   :  { %v1196_v49 = vpop.permute.xlu1 %1195 }
 0xbb9   :  { %1202 = vst.msk [vmem:[#allocation2] sm:$0xff] %vm1201_vm5, %v1196_v49 }
 0xbbc   :  { %v1198_v48 = vpop.permute.xlu1 %1197 }
 0xbbd   :  { %1203 = vst.msk [vmem:[#allocation2 + $0x8] sm:$0xff] %vm1201_vm5, %v1198_v48 }
 0xbbe   :  { %v3435_v52 = vpop.eup %3434 }
 0xbbf   :  { %v1547_v16 = vsel %vm753_vm3, %v3435_v52, 0.0 }
 0xbc0   :  { %v1429_v18 = vpop.permute.xlu1 %1428  ;;  %1548 = vadd.xlane.f32.xlu0 %v1547_v16 }
 0xbc1   :  { %1434 = vst.msk [vmem:[#allocation2 + $0x8] sm:$0xff] %vm1432_vm6, %v1429_v18 }
 0xbc2   :  { %v3437_v19 = vpop.eup %3436 }
 0xbc3   :  { %v1550_v21 = vsel %vm753_vm3, %v3437_v19, 0.0 }
 0xbc4   :  { %1551 = vadd.xlane.f32.xlu0 %v1550_v21 }
 0xbda   :  { %1607 = vrot.lane.b32.xlu0 %v3843_v55, %s3556_s25 }
 0xbde   :  { %1426 = vrot.lane.b32.xlu0 %v1370_v43, %s3542_s18 }
 0xc49   :  { %v1549_v22 = vpop.xlane.xlu0 %1548 }
 0xc4a   :  { %3438 = vrcp.f32 %v1549_v22 }
 0xc4d   :  { %v1552_v23 = vpop.xlane.xlu0 %1551 }
 0xc4e   :  { %3440 = vrcp.f32 %v1552_v23 }
 0xc51   :  { %v1608_v59 = vpop.permute.xlu0 %1607 }
 0xc52   :  { %v1613_v20 = vsel %vm876_vm4, %v1608_v59, 0 }
 0xc53   :  { %3219 = vmatpush3.bf16.msra.mxu1 %v1613_v20 }
 0xc54   :  { %3232 = vmatprep.subr.bf16.mxu1 %v3547_v61 }
 0xc55   :  { %v1427_v24 = vpop.permute.xlu0 %1426 }
 0xc56   :  { %1433 = vst.msk [vmem:[#allocation2] sm:$0xff] %vm1432_vm6, %v1427_v24 }
 0xc57   :  { %v3439_v25 = vpop.eup %3438 }
 0xc58   :  { %v1555_v28 = vmul.f32 %v3439_v25, %v3435_v52 }
 0xc5a   :  { %v1557_v29 = vpack.c.bf16 %v1555_v28, %v1555_v28 }
 0xc5b   :  { %v3441_v30 = vpop.eup %3440 }
 0xc5c   :  { %3215 = vmatmul.mubr.msk.bf16.vlgmr.msra.gmra.mxu0 %vm753_vm3, %v1557_v29  ;;  %v1556_v55 = vmul.f32 %v3441_v30, %v3437_v19 }
 0xc5d   :  { %3228 = vmatprep.mubr.msk.bf16.mxu0 %vm3548_vm1, %v3547_v61  ;;  %3225 = vmatpush3.bf16.msra.mxu0 %v3396_v34 }
 0xc5e   :  { %v1558_v32 = vpack.c.bf16 %v1556_v55, %v1556_v55  ;;  %3226 = vmatprep.subr.bf16.mxu0 %v3547_v61 }
 0xc60   :  { %3221 = vmatmul.mubr.msk.bf16.vlgmr.msra.gmra.mxu1 %vm753_vm3, %v1558_v32 }
 0xc61   :  { %3233 = vmatpush3.bf16.msra.mxu1 %v3394_v31  ;;  %3236 = vmatprep.mubr.msk.bf16.mxu1 %vm3548_vm1, %v3547_v61 }
 0xc62   :  { %3234 = vmatprep.subr.bf16.mxu1 %v3547_v61  ;;  %3227 = vmatpush3.bf16.msra.mxu0 %v3397_v57 }
 0xc63   :  { %3240 = vmatprep.subr.bf16.mxu0 %v3547_v61 }
 0xc65   :  { %3235 = vmatpush3.bf16.msra.mxu1 %v3395_v33 }
 0xc66   :  { %3248 = vmatprep.subr.bf16.mxu1 %v3547_v61 }
 0xc68   :  { %3237 = vmatmul.mubr.msk.bf16.vlgmr.msra.gmra.mxu1 %vm217_vm0, %v3831_v40 }
 0xc69   :  { %3250 = vmatprep.mubr.msk.bf16.mxu1 %vm3548_vm1, %v3547_v61 }
 0xd1c   :  { %v1601_v35 = vpop.f32.mrf.mxu0 }
 0xd1d   :  { %1657 = vrot.lane.b32.xlu0 %v1601_v35, %s3557_s7 }
 0xd1e   :  { %v3216_v40 = vpop.f32.mrf.mxu0 }
 0xd20   :  { %v1604_v36 = vpop.f32.mrf.mxu0  ;;  %v1649_v37 = vpop.f32.mrf.mxu1 }
 0xd21   :  { %1659 = vrot.lane.b32.xlu1 %v1649_v37, %s3557_s7  ;;  %1691 = vrot.lane.b32.xlu0 %v3795_v17, %s3558_s4 }
 0xd22   :  { %v3217_v41 = vpop.f32.mrf.mxu0  ;;  %v3222_v42 = vpop.f32.mrf.mxu1 }
 0xd24   :  { %v1652_v43 = vpop.f32.mrf.mxu1 }
 0xd25   :  { %1824 = vrot.lane.b32.xlu1 %v4042_v44, %s3550_s15 }
 0xd26   :  { %v3223_v45 = vpop.f32.mrf.mxu1 }
 0xd28   :  { %v1798_v46 = vpop.f32.mrf.mxu1 }
 0xd29   :  { %v1799_v52 = vadd.f32 %v4042_v44, %v1798_v46 }
 0xd2a   :  { %v3238_v47 = vpop.f32.mrf.mxu1 }
 0xd2b   :  { %v4082_v19 = vpack.c.bf16 %v1799_v52, %v1799_v52 }
 0xd2c   :  { %v1801_v50 = vpop.f32.mrf.mxu1 }
 0xd2d   :  { %v1802_v21 = vadd.f32 %v4042_v44, %v1801_v50 }
 0xd2e   :  { %v3239_v51 = vpop.f32.mrf.mxu1 }
 0xd2f   :  { %v4090_v22 = vpack.c.bf16 %v1802_v21, %v1802_v21 }
 0xd8f   :  { %v1658_v53 = vpop.permute.xlu0 %1657 }
 0xd90   :  { %1664 = vst.msk [vmem:[#allocation2] sm:$0xff] %vm1663_vm7, %v1658_v53 }
 0xd93   :  { %v1660_v54 = vpop.permute.xlu1 %1659  ;;  %v1692_v63 = vpop.permute.xlu0 %1691 }
 0xd94   :  { %1665 = vst.msk [vmem:[#allocation2 + $0x8] sm:$0xff] %vm1663_vm7, %v1660_v54 }
 0xd97   :  { %v1666_v17 = vld [vmem:[#allocation2] sm:$0xff] }
 0xd9b   :  { %v1667_v56 = vld [vmem:[#allocation2 + $0x8] sm:$0xff] }
 0xd9c   :  { %v1668_v58 = vpack.c.bf16 %v1667_v56, %v1666_v17 }
 0xd9e   :  { %3229 = vmatmul.mubr.msk.bf16.vlgmr.msra.gmra.mxu0 %vm217_vm0, %v1668_v58 }
 0xd9f   :  { %3244 = vmatprep.mubr.msk.bf16.mxu0 %vm3548_vm1, %v3547_v61  ;;  %3241 = vmatpush3.bf16.msra.mxu0 %v3398_v60 }
 0xda0   :  { %3242 = vmatprep.subr.bf16.mxu0 %v3547_v61 }
 0xda3   :  { %3243 = vmatpush3.bf16.msra.mxu0 %v3399_v62 }
 0xda4   :  { %3254 = vmatprep.subr.bf16.mxu0 %v3547_v61 }
 0xe5e   :  { %v1731_v0 = vpop.f32.mrf.mxu0 }
 0xe5f   :  { %v1732_v1 = vadd.f32 %v1731_v0, %v1692_v63 }
 0xe60   :  { %v3230_v2 = vpop.f32.mrf.mxu0 }
 0xe61   :  { %v1738_v3 = vadd.f32 %v1732_v1, %v3803_v26  ;;  %v1825_v26 = vpop.permute.xlu1 %1824 }
 0xe62   :  { %v1734_v5 = vpop.f32.mrf.mxu0 }
 0xe63   :  { %1740 = vst.msk [vmem:[%s4280_s13] sm:$0xff] %vm217_vm0, %v1738_v3  ;;  %v1735_v6 = vadd.f32 %v1734_v5, %v1692_v63 }
 0xe64   :  { %v3231_v7 = vpop.f32.mrf.mxu0 }
 0xe65   :  { %v1739_v9 = vadd.f32 %v1735_v6, %v3806_v27 }
 0xe67   :  { %1741 = vst.msk [vmem:[%s4280_s13 + $0x8] sm:$0xff] %vm217_vm0, %v1739_v9  ;;  %v1805_v10 = vpack.c.bf16 %v1739_v9, %v1738_v3 }
 0xe69   :  { %3245 = vmatmul.mubr.msk.bf16.vlgmr.msra.gmra.mxu0 %vm217_vm0, %v1805_v10 }
 0xe6a   :  { %3256 = vmatprep.mubr.msk.bf16.mxu0 %vm3548_vm1, %v3547_v61 }
 0xf29   :  { %v1864_v11 = vpop.f32.mrf.mxu0 }
 0xf2a   :  { %v1865_v12 = vadd.f32 %v1864_v11, %v1825_v26 }
 0xf2b   :  { %v3246_v13 = vpop.f32.mrf.mxu0 }
 0xf2c   :  { %v4072_v14 = vpack.c.bf16 %v1865_v12, %v1865_v12 }
 0xf2d   :  { %v1867_v15 = vpop.f32.mrf.mxu0 }
 0xf2e   :  { %v1868_v49 = vadd.f32 %v1867_v15, %v1825_v26  ;;  %v1879_v27 = vsel %vm753_vm3, %v4072_v14, 0 }
 0xf2f   :  { %v3247_v48 = vpop.f32.mrf.mxu0  ;;  %3249 = vmatpush3.bf16.xpose.msra.mxu1 %v1879_v27 }
 0xf30   :  { %v4077_v16 = vpack.c.bf16 %v1868_v49, %v1868_v49  ;;  %3260 = vmatprep.subr.bf16.mxu1 %v3547_v61 }
 0xf32   :  { %v1925_v18 = vsel %vm753_vm3, %v4077_v16, 0 }
 0xf33   :  { %3255 = vmatpush3.bf16.xpose.msra.mxu0 %v1925_v18 }
 0xf34   :  { %3266 = vmatprep.subr.bf16.mxu0 %v3547_v61 }
 0xf36   :  { %3251 = vmatmul.mubr.msk.bf16.vlgmr.msra.gmra.mxu1 %vm753_vm3, %v4082_v19 }
 0xf37   :  { %3262 = vmatprep.mubr.msk.bf16.mxu1 %vm3548_vm1, %v3547_v61 }
 0xf3a   :  { %3257 = vmatmul.mubr.msk.bf16.vlgmr.msra.gmra.mxu0 %vm753_vm3, %v4090_v22 }
 0xf3b   :  { %3268 = vmatprep.mubr.msk.bf16.mxu0 %vm3548_vm1, %v3547_v61 }
 0xff6   :  { %v1915_v23 = vpop.f32.mrf.mxu1 }
 0xff7   :  { %v1916_v59 = vadd.f32 %v1915_v23, %v3873_v4 }
 0xff8   :  { %v3252_v20 = vpop.f32.mrf.mxu1 }
 0xff9   :  { %v1967_v24 = vsel %vm753_vm3, %v1916_v59, -inf }
 0xffa   :  { %1968 = vmax.xlane.f32.xlu0 %v1967_v24  ;;  %v1918_v25 = vpop.f32.mrf.mxu1  ;;  %v1961_v28 = vpop.f32.mrf.mxu0 }
 0xffb   :  { %v1962_v29 = vadd.f32 %v1961_v28, %v3877_v8 }
 0xffc   :  { %v3253_v30 = vpop.f32.mrf.mxu1  ;;  %v3258_v55 = vpop.f32.mrf.mxu0 }
 0xffd   :  { %v1970_v31 = vsel %vm753_vm3, %v1962_v29, -inf }
 0xffe   :  { %1971 = vmax.xlane.f32.xlu1 %v1970_v31  ;;  %v1964_v32 = vpop.f32.mrf.mxu0 }
0x1000   :  { %v3259_v33 = vpop.f32.mrf.mxu0 }
0x100f   :  { %1992 = vrot.lane.b32.xlu1 %v4072_v14, %s3550_s15 }
0x1013   :  { %2094 = vrot.lane.b32.xlu1 %v4072_v14, %s3551_s8 }
0x1017   :  { %2145 = vrot.lane.b32.xlu1 %v4077_v16, %s3551_s8 }
0x101b   :  { %2143 = vrot.lane.b32.xlu1 %v4090_v22, %s3551_s8 }
0x1083   :  { %v1969_v34 = vpop.xlane.xlu0 %1968 }
0x1084   :  { %v1973_v57 = vsub.f32 %v1916_v59, %v1969_v34 }
0x1086   :  { %v1975_v35 = vmul.f32 1.442695, %v1973_v57 }
0x1087   :  { %v1972_v40 = vpop.xlane.xlu1 %1971 }
0x1088   :  { %3442 = vpow2.f32 %v1975_v35  ;;  %v1974_v36 = vsub.f32 %v1962_v29, %v1972_v40 }
0x108a   :  { %v1977_v37 = vmul.f32 1.442695, %v1974_v36 }
0x108b   :  { %v1993_v41 = vpop.permute.xlu1 %1992 }
0x108c   :  { %3444 = vpow2.f32 %v1977_v37  ;;  %v1998_v42 = vsel %vm876_vm4, %v1993_v41, 0 }
0x108d   :  { %3261 = vmatpush3.bf16.msra.mxu1 %v1998_v42 }
0x108e   :  { %3272 = vmatprep.subr.bf16.mxu1 %v3547_v61 }
0x108f   :  { %v2095_v56 = vpop.permute.xlu1 %2094 }
0x1090   :  { %v2100_v63 = vsel %vm753_vm3, %v2095_v56, 0 }
0x1093   :  { %v2146_v1 = vpop.permute.xlu1 %2145 }
0x1094   :  { %v2151_v3 = vsel %vm753_vm3, %v2146_v1, 0 }
0x1095   :  { %v3443_v43 = vpop.eup %3442 }
0x1096   :  { %v1979_v45 = vsel %vm753_vm3, %v3443_v43, 0.0 }
0x1097   :  { %1980 = vadd.xlane.f32.xlu0 %v1979_v45  ;;  %v2144_v6 = vpop.permute.xlu1 %2143 }
0x1099   :  { %v3445_v46 = vpop.eup %3444 }
0x109a   :  { %v1982_v47 = vsel %vm753_vm3, %v3445_v46, 0.0 }
0x109b   :  { %1983 = vadd.xlane.f32.xlu0 %v1982_v47 }
0x10b1   :  { %2041 = vrot.lane.b32.xlu0 %v4077_v16, %s3550_s15 }
0x10b5   :  { %2092 = vrot.lane.b32.xlu0 %v4082_v19, %s3551_s8 }
0x1120   :  { %v1981_v50 = vpop.xlane.xlu0 %1980 }
0x1121   :  { %3446 = vrcp.f32 %v1981_v50 }
0x1124   :  { %v1984_v51 = vpop.xlane.xlu0 %1983 }
0x1125   :  { %3448 = vrcp.f32 %v1984_v51 }
0x1128   :  { %v2042_v53 = vpop.permute.xlu0 %2041 }
0x1129   :  { %v2047_v54 = vsel %vm876_vm4, %v2042_v53, 0 }
0x112a   :  { %3267 = vmatpush3.bf16.msra.mxu0 %v2047_v54 }
0x112b   :  { %3278 = vmatprep.subr.bf16.mxu0 %v3547_v61 }
0x112c   :  { %v2093_v5 = vpop.permute.xlu0 %2092 }
0x112e   :  { %v3447_v17 = vpop.eup %3446 }
0x112f   :  { %v1987_v58 = vmul.f32 %v3447_v17, %v3443_v43 }
0x1131   :  { %v1989_v60 = vpack.c.bf16 %v1987_v58, %v1987_v58 }
0x1132   :  { %v3449_v62 = vpop.eup %3448 }
0x1133   :  { %3263 = vmatmul.mubr.msk.bf16.vlgmr.msra.gmra.mxu1 %vm753_vm3, %v1989_v60  ;;  %v1988_v0 = vmul.f32 %v3449_v62, %v3445_v46 }
0x1134   :  { %3273 = vmatpush3.bf16.xpose.msra.mxu1 %v2100_v63  ;;  %3274 = vmatprep.mubr.msk.bf16.mxu1 %vm3548_vm1, %v3547_v61 }
0x1135   :  { %v1990_v2 = vpack.c.bf16 %v1988_v0, %v1988_v0  ;;  %3284 = vmatprep.subr.bf16.mxu1 %v3547_v61 }
0x1137   :  { %3269 = vmatmul.mubr.msk.bf16.vlgmr.msra.gmra.mxu0 %vm753_vm3, %v1990_v2 }
0x1138   :  { %3279 = vmatpush3.bf16.xpose.msra.mxu0 %v2151_v3  ;;  %3280 = vmatprep.mubr.msk.bf16.mxu0 %vm3548_vm1, %v3547_v61 }
0x1139   :  { %3290 = vmatprep.subr.bf16.mxu0 %v3547_v61 }
0x113b   :  { %3275 = vmatmul.mubr.msk.bf16.vlgmr.msra.gmra.mxu1 %vm753_vm3, %v2093_v5 }
0x113c   :  { %3286 = vmatprep.mubr.msk.bf16.mxu1 %vm3548_vm1, %v3547_v61 }
0x113f   :  { %3281 = vmatmul.mubr.msk.bf16.vlgmr.msra.gmra.mxu0 %vm753_vm3, %v2144_v6 }
0x1140   :  { %3292 = vmatprep.mubr.msk.bf16.mxu0 %vm3548_vm1, %v3547_v61 }
0x11f3   :  { %v2034_v7 = vpop.f32.mrf.mxu1 }
0x11f4   :  { %2089 = vst.msk [vmem:[#allocation2] sm:$0xff] %vm753_vm3, %v2034_v7 }
0x11f5   :  { %v3264_v9 = vpop.f32.mrf.mxu1 }
0x11f7   :  { %v2037_v10 = vpop.f32.mrf.mxu1  ;;  %v2083_v26 = vpop.f32.mrf.mxu0 }
0x11f8   :  { %2090 = vst.msk [vmem:[#allocation2 + $0x8] sm:$0xff] %vm753_vm3, %v2083_v26 }
0x11f9   :  { %v3265_v11 = vpop.f32.mrf.mxu1  ;;  %v3270_v12 = vpop.f32.mrf.mxu0 }
0x11fb   :  { %v2086_v13 = vpop.f32.mrf.mxu0  ;;  %v2136_v15 = vpop.f32.mrf.mxu1 }
0x11fc   :  { %v2137_v49 = vadd.f32 %v2136_v15, %v3873_v4 }
0x11fd   :  { %v3271_v27 = vpop.f32.mrf.mxu0  ;;  %v3276_v48 = vpop.f32.mrf.mxu1 }
0x11fe   :  { %v2193_v52 = vsel %vm753_vm3, %v2137_v49, -inf }
0x11ff   :  { %2194 = vmax.xlane.f32.xlu0 %v2193_v52  ;;  %v2139_v18 = vpop.f32.mrf.mxu1  ;;  %v2187_v21 = vpop.f32.mrf.mxu0 }
0x1200   :  { %v2188_v23 = vadd.f32 %v2187_v21, %v3877_v8 }
0x1201   :  { %v3277_v59 = vpop.f32.mrf.mxu1  ;;  %v3282_v20 = vpop.f32.mrf.mxu0 }
0x1202   :  { %v2196_v24 = vsel %vm753_vm3, %v2188_v23, -inf }
0x1203   :  { %2197 = vmax.xlane.f32.xlu1 %v2196_v24  ;;  %v2190_v25 = vpop.f32.mrf.mxu0 }
0x1205   :  { %v3283_v28 = vpop.f32.mrf.mxu0 }
0x1214   :  { %2217 = vrot.lane.b32.xlu1 %v4072_v14, %s3552_s3 }
0x1218   :  { %2325 = vrot.lane.b32.xlu1 %v4072_v14, %s3553_s2 }
0x121c   :  { %2375 = vrot.lane.b32.xlu1 %v4077_v16, %s3553_s2 }
0x1220   :  { %2373 = vrot.lane.b32.xlu1 %v4090_v22, %s3553_s2 }
0x1288   :  { %v2195_v29 = vpop.xlane.xlu0 %2194 }
0x1289   :  { %v2199_v30 = vsub.f32 %v2137_v49, %v2195_v29 }
0x128b   :  { %v2201_v55 = vmul.f32 1.442695, %v2199_v30 }
0x128c   :  { %v2198_v31 = vpop.xlane.xlu1 %2197 }
0x128d   :  { %3450 = vpow2.f32 %v2201_v55  ;;  %v2200_v32 = vsub.f32 %v2188_v23, %v2198_v31 }
0x128f   :  { %v2203_v33 = vmul.f32 1.442695, %v2200_v32 }
0x1290   :  { %v2218_v34 = vpop.permute.xlu1 %2217 }
0x1291   :  { %3452 = vpow2.f32 %v2203_v33  ;;  %v2223_v57 = vsel %vm876_vm4, %v2218_v34, 0 }
0x1292   :  { %3285 = vmatpush3.bf16.msra.mxu1 %v2223_v57 }
0x1293   :  { %3296 = vmatprep.subr.bf16.mxu1 %v3547_v61 }
0x1294   :  { %v2326_v47 = vpop.permute.xlu1 %2325 }
0x1295   :  { %v2331_v54 = vsel %vm753_vm3, %v2326_v47, 0 }
0x1298   :  { %v2376_v56 = vpop.permute.xlu1 %2375 }
0x1299   :  { %v2381_v60 = vsel %vm753_vm3, %v2376_v56, 0 }
0x129a   :  { %v3451_v35 = vpop.eup %3450 }
0x129b   :  { %v2205_v40 = vsel %vm753_vm3, %v3451_v35, 0.0 }
0x129c   :  { %2206 = vadd.xlane.f32.xlu0 %v2205_v40  ;;  %v2374_v63 = vpop.permute.xlu1 %2373 }
0x129e   :  { %v3453_v36 = vpop.eup %3452 }
0x129f   :  { %v2208_v37 = vsel %vm753_vm3, %v3453_v36, 0.0 }
0x12a0   :  { %2209 = vadd.xlane.f32.xlu0 %v2208_v37 }
0x12b6   :  { %2265 = vrot.lane.b32.xlu0 %v4077_v16, %s3552_s3 }
0x12ba   :  { %2323 = vrot.lane.b32.xlu0 %v4082_v19, %s3553_s2 }
0x1325   :  { %v2207_v41 = vpop.xlane.xlu0 %2206 }
0x1326   :  { %3454 = vrcp.f32 %v2207_v41 }
0x1329   :  { %v2210_v42 = vpop.xlane.xlu0 %2209 }
0x132a   :  { %3456 = vrcp.f32 %v2210_v42 }
0x132d   :  { %v2266_v43 = vpop.permute.xlu0 %2265 }
0x132e   :  { %v2271_v45 = vsel %vm876_vm4, %v2266_v43, 0 }
0x132f   :  { %3291 = vmatpush3.bf16.msra.mxu0 %v2271_v45 }
0x1330   :  { %3302 = vmatprep.subr.bf16.mxu0 %v3547_v61 }
0x1331   :  { %v2324_v62 = vpop.permute.xlu0 %2323 }
0x1333   :  { %v3455_v46 = vpop.eup %3454 }
0x1334   :  { %v2213_v50 = vmul.f32 %v3455_v46, %v3451_v35 }
0x1336   :  { %v2215_v51 = vpack.c.bf16 %v2213_v50, %v2213_v50 }
0x1337   :  { %v3457_v53 = vpop.eup %3456 }
0x1338   :  { %3287 = vmatmul.mubr.msk.bf16.vlgmr.msra.gmra.mxu1 %vm753_vm3, %v2215_v51  ;;  %v2214_v17 = vmul.f32 %v3457_v53, %v3453_v36 }
0x1339   :  { %3297 = vmatpush3.bf16.xpose.msra.mxu1 %v2331_v54  ;;  %3298 = vmatprep.mubr.msk.bf16.mxu1 %vm3548_vm1, %v3547_v61 }
0x133a   :  { %v2216_v58 = vpack.c.bf16 %v2214_v17, %v2214_v17  ;;  %3308 = vmatprep.subr.bf16.mxu1 %v3547_v61 }
0x133c   :  { %3293 = vmatmul.mubr.msk.bf16.vlgmr.msra.gmra.mxu0 %vm753_vm3, %v2216_v58 }
0x133d   :  { %3303 = vmatpush3.bf16.xpose.msra.mxu0 %v2381_v60  ;;  %3304 = vmatprep.mubr.msk.bf16.mxu0 %vm3548_vm1, %v3547_v61 }
0x133e   :  { %3314 = vmatprep.subr.bf16.mxu0 %v3547_v61 }
0x1340   :  { %3299 = vmatmul.mubr.msk.bf16.vlgmr.msra.gmra.mxu1 %vm753_vm3, %v2324_v62 }
0x1341   :  { %3310 = vmatprep.mubr.msk.bf16.mxu1 %vm3548_vm1, %v3547_v61 }
0x1344   :  { %3305 = vmatmul.mubr.msk.bf16.vlgmr.msra.gmra.mxu0 %vm753_vm3, %v2374_v63 }
0x1345   :  { %3316 = vmatprep.mubr.msk.bf16.mxu0 %vm3548_vm1, %v3547_v61 }
0x13f8   :  { %v4174_v0 = vpop.f32.mrf.mxu1 }
0x13fa   :  { %v3288_v1 = vpop.f32.mrf.mxu1 }
0x13fc   :  { %v2262_v2 = vpop.f32.mrf.mxu1  ;;  %v4176_v3 = vpop.f32.mrf.mxu0 }
0x13fe   :  { %v3289_v5 = vpop.f32.mrf.mxu1  ;;  %v3294_v6 = vpop.f32.mrf.mxu0 }
0x1400   :  { %v2310_v7 = vpop.f32.mrf.mxu0  ;;  %v2367_v9 = vpop.f32.mrf.mxu1 }
0x1401   :  { %v2368_v10 = vadd.f32 %v2367_v9, %v3873_v4 }
0x1402   :  { %v3295_v26 = vpop.f32.mrf.mxu0  ;;  %v3300_v11 = vpop.f32.mrf.mxu1 }
0x1403   :  { %v2423_v12 = vsel %vm753_vm3, %v2368_v10, -inf }
0x1404   :  { %2424 = vmax.xlane.f32.xlu0 %v2423_v12  ;;  %v2370_v13 = vpop.f32.mrf.mxu1  ;;  %v2417_v15 = vpop.f32.mrf.mxu0 }
0x1405   :  { %v2418_v49 = vadd.f32 %v2417_v15, %v3877_v8 }
0x1406   :  { %v3301_v27 = vpop.f32.mrf.mxu1  ;;  %v3306_v48 = vpop.f32.mrf.mxu0 }
0x1407   :  { %v2426_v52 = vsel %vm753_vm3, %v2418_v49, -inf }
0x1408   :  { %2427 = vmax.xlane.f32.xlu1 %v2426_v52  ;;  %v2420_v18 = vpop.f32.mrf.mxu0 }
0x140a   :  { %v3307_v21 = vpop.f32.mrf.mxu0 }
0x1419   :  { %2447 = vrot.lane.b32.xlu1 %v4072_v14, %s3554_s23 }
0x141d   :  { %2555 = vrot.lane.b32.xlu1 %v4072_v14, %s3555_s24 }
0x1421   :  { %2605 = vrot.lane.b32.xlu1 %v4077_v16, %s3555_s24 }
0x1425   :  { %2603 = vrot.lane.b32.xlu1 %v4090_v22, %s3555_s24 }
0x148d   :  { %v2425_v23 = vpop.xlane.xlu0 %2424 }
0x148e   :  { %v2429_v59 = vsub.f32 %v2368_v10, %v2425_v23 }
0x1490   :  { %v2431_v20 = vmul.f32 1.442695, %v2429_v59 }
0x1491   :  { %v2428_v24 = vpop.xlane.xlu1 %2427 }
0x1492   :  { %3458 = vpow2.f32 %v2431_v20  ;;  %v2430_v25 = vsub.f32 %v2418_v49, %v2428_v24 }
0x1494   :  { %v2433_v28 = vmul.f32 1.442695, %v2430_v25 }
0x1495   :  { %v2448_v29 = vpop.permute.xlu1 %2447 }
0x1496   :  { %3460 = vpow2.f32 %v2433_v28  ;;  %v2453_v30 = vsel %vm876_vm4, %v2448_v29, 0 }
0x1497   :  { %3309 = vmatpush3.bf16.msra.mxu1 %v2453_v30 }
0x1498   :  { %3320 = vmatprep.subr.bf16.mxu1 %v3547_v61 }
0x1499   :  { %v2556_v36 = vpop.permute.xlu1 %2555 }
0x149a   :  { %v2561_v43 = vsel %vm753_vm3, %v2556_v36, 0 }
0x149d   :  { %v2606_v45 = vpop.permute.xlu1 %2605 }
0x149e   :  { %v2611_v47 = vsel %vm753_vm3, %v2606_v45, 0 }
0x149f   :  { %v3459_v55 = vpop.eup %3458 }
0x14a0   :  { %v2435_v31 = vsel %vm753_vm3, %v3459_v55, 0.0 }
0x14a1   :  { %2436 = vadd.xlane.f32.xlu0 %v2435_v31  ;;  %v2604_v51 = vpop.permute.xlu1 %2603 }
0x14a3   :  { %v3461_v32 = vpop.eup %3460 }
0x14a4   :  { %v2438_v22 = vsel %vm753_vm3, %v3461_v32, 0.0 }
0x14a5   :  { %2439 = vadd.xlane.f32.xlu0 %v2438_v22 }
0x14bb   :  { %2495 = vrot.lane.b32.xlu0 %v4077_v16, %s3554_s23 }
0x14bf   :  { %2553 = vrot.lane.b32.xlu0 %v4082_v19, %s3555_s24 }
0x152a   :  { %v2437_v33 = vpop.xlane.xlu0 %2436 }
0x152b   :  { %3462 = vrcp.f32 %v2437_v33 }
0x152e   :  { %v2440_v34 = vpop.xlane.xlu0 %2439 }
0x152f   :  { %3464 = vrcp.f32 %v2440_v34 }
0x1532   :  { %v2496_v57 = vpop.permute.xlu0 %2495 }
0x1533   :  { %v2501_v35 = vsel %vm876_vm4, %v2496_v57, 0  ;;  %v3400_v57 = vld [vmem:[%s4278_s11 + $0x18] sm:$0xff]  }
0x1534   :  { %3315 = vmatpush3.bf16.msra.mxu0 %v2501_v35  ;;  %v3401_v35 = vld [vmem:[%s4278_s11 + $0x10] sm:$0xff]  }
0x1535   :  { %3326 = vmatprep.subr.bf16.mxu0 %v3547_v61 }
0x1536   :  { %v2554_v50 = vpop.permute.xlu0 %2553 }
0x1538   :  { %v3463_v40 = vpop.eup %3462 }
0x1539   :  { %v2443_v37 = vmul.f32 %v3463_v40, %v3459_v55 }
0x153b   :  { %v2445_v41 = vpack.c.bf16 %v2443_v37, %v2443_v37 }
0x153c   :  { %v3465_v42 = vpop.eup %3464 }
0x153d   :  { %3311 = vmatmul.mubr.msk.bf16.vlgmr.msra.gmra.mxu1 %vm753_vm3, %v2445_v41  ;;  %v2444_v19 = vmul.f32 %v3465_v42, %v3461_v32 }
0x153e   :  { %3321 = vmatpush3.bf16.xpose.msra.mxu1 %v2561_v43  ;;  %3322 = vmatprep.mubr.msk.bf16.mxu1 %vm3548_vm1, %v3547_v61 }
0x153f   :  { %v2446_v46 = vpack.c.bf16 %v2444_v19, %v2444_v19  ;;  %3332 = vmatprep.subr.bf16.mxu1 %v3547_v61 }
0x1541   :  { %3317 = vmatmul.mubr.msk.bf16.vlgmr.msra.gmra.mxu0 %vm753_vm3, %v2446_v46 }
0x1542   :  { %3327 = vmatpush3.bf16.xpose.msra.mxu0 %v2611_v47  ;;  %3328 = vmatprep.mubr.msk.bf16.mxu0 %vm3548_vm1, %v3547_v61 }
0x1543   :  { %3338 = vmatprep.subr.bf16.mxu0 %v3547_v61 }
0x1545   :  { %3323 = vmatmul.mubr.msk.bf16.vlgmr.msra.gmra.mxu1 %vm753_vm3, %v2554_v50 }
0x1546   :  { %3334 = vmatprep.mubr.msk.bf16.mxu1 %vm3548_vm1, %v3547_v61 }
0x1549   :  { %3329 = vmatmul.mubr.msk.bf16.vlgmr.msra.gmra.mxu0 %vm753_vm3, %v2604_v51 }
0x154a   :  { %3340 = vmatprep.mubr.msk.bf16.mxu0 %vm3548_vm1, %v3547_v61 }
0x15fd   :  { %v2489_v53 = vpop.f32.mrf.mxu1 }
0x15ff   :  { %v3312_v54 = vpop.f32.mrf.mxu1 }
0x1601   :  { %v2492_v17 = vpop.f32.mrf.mxu1  ;;  %v2537_v56 = vpop.f32.mrf.mxu0 }
0x1603   :  { %v3313_v58 = vpop.f32.mrf.mxu1  ;;  %v3318_v60 = vpop.f32.mrf.mxu0 }
0x1605   :  { %v2540_v62 = vpop.f32.mrf.mxu0  ;;  %v2597_v63 = vpop.f32.mrf.mxu1 }
0x1606   :  { %v2598_v1 = vadd.f32 %v2597_v63, %v3873_v4 }
0x1607   :  { %v3319_v2 = vpop.f32.mrf.mxu0  ;;  %v3324_v5 = vpop.f32.mrf.mxu1 }
0x1608   :  { %v2653_v6 = vsel %vm753_vm3, %v2598_v1, -inf }
0x1609   :  { %2654 = vmax.xlane.f32.xlu0 %v2653_v6  ;;  %v2600_v7 = vpop.f32.mrf.mxu1  ;;  %v2647_v9 = vpop.f32.mrf.mxu0 }
0x160a   :  { %v2648_v10 = vadd.f32 %v2647_v9, %v3877_v8 }
0x160b   :  { %v3325_v26 = vpop.f32.mrf.mxu1  ;;  %v3330_v11 = vpop.f32.mrf.mxu0 }
0x160c   :  { %v2656_v12 = vsel %vm753_vm3, %v2648_v10, -inf }
0x160d   :  { %2657 = vmax.xlane.f32.xlu1 %v2656_v12  ;;  %v2650_v13 = vpop.f32.mrf.mxu0 }
0x160f   :  { %v3331_v15 = vpop.f32.mrf.mxu0 }
0x161e   :  { %2677 = vrot.lane.b32.xlu1 %v4072_v14, %s3556_s25 }
0x1622   :  { %2315 = vrot.lane.b32.xlu1 %v4174_v0, %s3540_s29 }
0x1626   :  { %2317 = vrot.lane.b32.xlu1 %v4176_v3, %s3540_s29 }
0x162a   :  { %2547 = vrot.lane.b32.xlu1 %v2537_v56, %s3542_s18 }
0x1692   :  { %v2655_v4 = vpop.xlane.xlu0 %2654 }
0x1693   :  { %v2659_v8 = vsub.f32 %v2598_v1, %v2655_v4 }
0x1695   :  { %v2661_v49 = vmul.f32 1.442695, %v2659_v8 }
0x1696   :  { %v2658_v27 = vpop.xlane.xlu1 %2657 }
0x1697   :  { %3466 = vpow2.f32 %v2661_v49  ;;  %v2660_v48 = vsub.f32 %v2648_v10, %v2658_v27 }
0x1699   :  { %v2663_v52 = vmul.f32 1.442695, %v2660_v48 }
0x169a   :  { %v2678_v18 = vpop.permute.xlu1 %2677 }
0x169b   :  { %3468 = vpow2.f32 %v2663_v52  ;;  %v2683_v21 = vsel %vm876_vm4, %v2678_v18, 0 }
0x169c   :  { %3333 = vmatpush3.bf16.msra.mxu1 %v2683_v21 }
0x169d   :  { %3344 = vmatprep.subr.bf16.mxu1 %v3547_v61 }
0x169e   :  { %v2316_v14 = vpop.permute.xlu1 %2315 }
0x169f   :  { %2321 = vst.msk [vmem:[#allocation2] sm:$0xff] %vm1201_vm5, %v2316_v14 }
0x16a2   :  { %v2318_v0 = vpop.permute.xlu1 %2317 }
0x16a3   :  { %2322 = vst.msk [vmem:[#allocation2 + $0x8] sm:$0xff] %vm1201_vm5, %v2318_v0 }
0x16a4   :  { %v3467_v3 = vpop.eup %3466 }
0x16a5   :  { %v2665_v23 = vsel %vm753_vm3, %v3467_v3, 0.0 }
0x16a6   :  { %2666 = vadd.xlane.f32.xlu0 %v2665_v23  ;;  %v2548_v59 = vpop.permute.xlu1 %2547 }
0x16a7   :  { %2552 = vst.msk [vmem:[#allocation2 + $0x8] sm:$0xff] %vm1432_vm6, %v2548_v59 }
0x16a8   :  { %v3469_v20 = vpop.eup %3468 }
0x16a9   :  { %v2668_v24 = vsel %vm753_vm3, %v3469_v20, 0.0 }
0x16aa   :  { %2669 = vadd.xlane.f32.xlu0 %v2668_v24 }
0x16c0   :  { %2725 = vrot.lane.b32.xlu0 %v4077_v16, %s3556_s25 }
0x16c4   :  { %2545 = vrot.lane.b32.xlu0 %v2489_v53, %s3542_s18 }
0x172f   :  { %v2667_v25 = vpop.xlane.xlu0 %2666 }
0x1730   :  { %3470 = vrcp.f32 %v2667_v25 }
0x1733   :  { %v2670_v28 = vpop.xlane.xlu0 %2669 }
0x1734   :  { %3472 = vrcp.f32 %v2670_v28 }
0x1737   :  { %v2726_v29 = vpop.permute.xlu0 %2725 }
0x1738   :  { %v2731_v30 = vsel %vm876_vm4, %v2726_v29, 0 }
0x1739   :  { %3339 = vmatpush3.bf16.msra.mxu0 %v2731_v30 }
0x173b   :  { %v2546_v55 = vpop.permute.xlu0 %2545 }
0x173c   :  { %2551 = vst.msk [vmem:[#allocation2] sm:$0xff] %vm1432_vm6, %v2546_v55 }
0x173d   :  { %v3471_v31 = vpop.eup %3470 }
0x173e   :  { %v2673_v32 = vmul.f32 %v3471_v31, %v3467_v3 }
0x1740   :  { %v2675_v22 = vpack.c.bf16 %v2673_v32, %v2673_v32 }
0x1741   :  { %v3473_v33 = vpop.eup %3472 }
0x1742   :  { %3335 = vmatmul.mubr.msk.bf16.vlgmr.msra.gmra.mxu1 %vm753_vm3, %v2675_v22  ;;  %v2674_v16 = vmul.f32 %v3473_v33, %v3469_v20 }
0x1743   :  { %3348 = vmatprep.mubr.msk.bf16.mxu1 %vm3548_vm1, %v3547_v61  ;;  %3345 = vmatpush3.bf16.msra.mxu1 %v3400_v57 }
0x1744   :  { %v2676_v34 = vpack.c.bf16 %v2674_v16, %v2674_v16  ;;  %3346 = vmatprep.subr.bf16.mxu1 %v3547_v61 }
0x1746   :  { %3341 = vmatmul.mubr.msk.bf16.vlgmr.msra.gmra.mxu0 %vm753_vm3, %v2676_v34 }
0x1747   :  { %3347 = vmatpush3.bf16.msra.mxu1 %v3401_v35 }
0x1802   :  { %v2719_v40 = vpop.f32.mrf.mxu1 }
0x1803   :  { %2775 = vrot.lane.b32.xlu0 %v2719_v40, %s3557_s7 }
0x1804   :  { %v3336_v36 = vpop.f32.mrf.mxu1 }
0x1806   :  { %v2722_v37 = vpop.f32.mrf.mxu1  ;;  %v2767_v41 = vpop.f32.mrf.mxu0 }
0x1807   :  { %2777 = vrot.lane.b32.xlu1 %v2767_v41, %s3557_s7  ;;  %2809 = vrot.lane.b32.xlu0 %v4042_v44, %s3558_s4 }
0x1808   :  { %v3337_v42 = vpop.f32.mrf.mxu1  ;;  %v3342_v43 = vpop.f32.mrf.mxu0 }
0x180a   :  { %v2770_v19 = vpop.f32.mrf.mxu0 }
0x180c   :  { %v3343_v45 = vpop.f32.mrf.mxu0 }
0x1875   :  { %v2776_v46 = vpop.permute.xlu0 %2775 }
0x1876   :  { %2781 = vst.msk [vmem:[#allocation2] sm:$0xff] %vm1663_vm7, %v2776_v46 }
0x1879   :  { %v2778_v61 = vpop.permute.xlu1 %2777  ;;  %v2810_v53 = vpop.permute.xlu0 %2809 }
0x187a   :  { %2782 = vst.msk [vmem:[#allocation2 + $0x8] sm:$0xff] %vm1663_vm7, %v2778_v61 }
0x187d   :  { %v2783_v47 = vld [vmem:[#allocation2] sm:$0xff] }
0x1881   :  { %v2784_v50 = vld [vmem:[#allocation2 + $0x8] sm:$0xff] }
0x1882   :  { %v2785_v51 = vpack.c.bf16 %v2784_v50, %v2783_v47 }
0x1884   :  { %3349 = vmatmul.mubr.msk.bf16.vlgmr.msra.gmra.mxu1 %vm217_vm0, %v2785_v51 }
0x1944   :  { %v2849_v54 = vpop.f32.mrf.mxu1 }
0x1945   :  { %v2850_v17 = vadd.f32 %v2849_v54, %v2810_v53 }
0x1946   :  { %v3350_v56 = vpop.f32.mrf.mxu1 }
0x1947   :  { %v2856_v44 = vadd.f32 %v2850_v17, %v3824_v38 }
0x1948   :  { %v2852_v58 = vpop.f32.mrf.mxu1 }
0x1949   :  { %2972 = vst.msk [vmem:[%s4280_s13 + $0x10] sm:$0xff] %vm217_vm0, %v2856_v44  ;;  %v2853_v60 = vadd.f32 %v2852_v58, %v2810_v53 }
0x194a   :  { %v3351_v62 = vpop.f32.mrf.mxu1 }
0x194b   :  { %v2857_v63 = vadd.f32 %v2853_v60, %v3827_v39 }
0x194d   :  { %2973 = vst.msk [vmem:[%s4280_s13 + $0x18] sm:$0xff] %vm217_vm0, %v2857_v63 }
0x194e   :  { %2865 = vsyncpa [#allocation4], 1 }
0x194f   :  { %2866 = vsyncpa [#allocation6], 1 }

</bundles_post_ra>
